<compile_context>
chip_gen: v6e
topology: v6e:2x2x1
jax: 0.10.0
libtpu: 0.0.40
codegen_flags: <defaults>
</compile_context>

<pallas_src>
import jax
import jax.numpy as jnp
from jax import lax
from jax.experimental import pallas as pl
from jax.experimental.pallas import tpu as pltpu

SERIES_NUM = 3
HIDDEN = 32
MLP_HIDDEN = 10


def _round_up(x, m):
    return (x + m - 1) // m * m


def _choose_block_b(B, tile_b=256):
    """Lane-dense batch tile. >=2 grid steps for large B (v7x: 2 TCs), cap 256."""
    if B <= 128:
        return 128
    half = _round_up((B + 1) // 2, 128)
    return int(min(tile_b, half))


def dnet_kernel(x_ref, wbd_ref, whh_ref, b_ref, w1_ref, b1_ref, w2_ref, b2_ref,
                out_ref):
    """One batch tile of the DNet forward (batch-in-lanes layout).

    x_ref  : (T*I, Bb)      bf16, row = t*I + feature, batch on lanes
    wbd_ref: (T*4H, T*I)    bf16, block-diag of W_ih (i,f,o rows pre-scaled 0.5)
    whh_ref: (4H, H)        bf16, gate rows (i, f, o, g), i/f/o pre-scaled 0.5
    b_ref  : (4H, Bb)       f32, bias_ih + bias_hh, same reorder/scale
    w1_ref : (10, H) bf16, b1_ref: (10, Bb) f32
    w2_ref : (1, 10) bf16, b2_ref: (1, Bb)  f32
    out_ref: (1, Bb)        f32
    """
    G = whh_ref.shape[0]          # 4H = 128
    H = whh_ref.shape[1]          # 32
    Bb = x_ref.shape[1]
    T = wbd_ref.shape[0] // G

    whh = whh_ref[...]
    bias = b_ref[...]             # already broadcast to (4H, Bb) in wrapper

    # Fused, hoisted input projection: a single MXU matmul covering all T
    # steps (block-diagonal weight), independent of the recurrent state.
    xg = jnp.dot(wbd_ref[...], x_ref[...],
                 preferred_element_type=jnp.float32)      # (T*4H, Bb) f32

    h = jnp.zeros((H, Bb), jnp.float32)
    c = jnp.zeros((H, Bb), jnp.float32)
    for t in range(T):            # static trip count -> fully unrolled
        # (xg slice + bias) is h-independent; the scheduler hoists it off the
        # serial chain.  Recurrent matmul: (4H,H)bf16 @ (H,Bb)bf16 -> f32.
        gates = (xg[t * G:(t + 1) * G, :] + bias) + jnp.dot(
            h.astype(jnp.bfloat16).T.T if False else whh,   # keep whh as lhs
            h.astype(jnp.bfloat16), preferred_element_type=jnp.float32)
        # Single EUP stream over the whole aligned (4H, Bb) block.
        act = jnp.tanh(gates)
        # i/f/o rows were pre-scaled by 0.5 -> sigmoid(z) = 0.5*tanh(z/2)+0.5.
        i_g = 0.5 * act[0 * H:1 * H, :] + 0.5
        f_g = 0.5 * act[1 * H:2 * H, :] + 0.5
        o_g = 0.5 * act[2 * H:3 * H, :] + 0.5
        g_g = act[3 * H:4 * H, :]
        c = f_g * c + i_g * g_g
        h = o_g * jnp.tanh(c)

    # MLP head (feature-major): Linear(32,10) -> ReLU -> Linear(10,1) -> Sigmoid
    hid = jnp.dot(w1_ref[...], h.astype(jnp.bfloat16),
                  preferred_element_type=jnp.float32) + b1_ref[...]
    hid = jnp.maximum(hid, 0.0)
    logit = jnp.dot(w2_ref[...], hid.astype(jnp.bfloat16),
                    preferred_element_type=jnp.float32) + b2_ref[...]
    out_ref[...] = jax.nn.sigmoid(logit)                   # (1, Bb), lane-dense


def _reorder_gate_rows(a):
    """Permute leading-axis gate blocks from PyTorch (i,f,g,o) to (i,f,o,g)."""
    i, f, g, o = jnp.split(a, 4, axis=0)
    return jnp.concatenate([i, f, o, g], axis=0)


def _prepare_kernel_params(params, T, block_b):
    """Transform logical (PyTorch-shaped) params into the kernel layout."""
    H = HIDDEN
    G = 4 * H
    w_ih = _reorder_gate_rows(params["w_ih"])                    # (4H, I)
    w_hh = _reorder_gate_rows(params["w_hh"])                    # (4H, H)
    b = _reorder_gate_rows(params["b_ih"] + params["b_hh"])      # (4H,)

    # sigmoid(z) = 0.5*(tanh(z/2)+1): pre-scale i/f/o rows (now [0:3H]) by 0.5
    # so the kernel runs one tanh over the full gate block.
    scale = jnp.concatenate([jnp.full((3 * H,), 0.5, jnp.float32),
                             jnp.ones((H,), jnp.float32)])
    w_ih = w_ih * scale[:, None]
    w_hh = w_hh * scale[:, None]
    b = b * scale

    # Block-diagonal input-projection weight: one fused MXU matmul for all T.
    w_bd = jnp.kron(jnp.eye(T, dtype=jnp.float32), w_ih)         # (T*4H, T*I)

    return dict(
        w_bd=w_bd.astype(jnp.bfloat16),
        w_hh=w_hh.astype(jnp.bfloat16),
        b=jnp.broadcast_to(b[:, None], (G, block_b)).astype(jnp.float32),
        w1=params["w1"].astype(jnp.bfloat16),                    # (10, H)
        b1=jnp.broadcast_to(params["b1"][:, None],
                            (MLP_HIDDEN, block_b)).astype(jnp.float32),
        w2=params["w2"].astype(jnp.bfloat16),                    # (1, 10)
        b2=jnp.broadcast_to(params["b2"][:, None],
                            (1, block_b)).astype(jnp.float32),
    )


def dnet_forward(x, params, *, tile_b=256):
    """x: (B, T, I) float32, batch-first like the PyTorch module. -> (B, 1)."""
    B, T, I = x.shape
    block_b = _choose_block_b(B, tile_b)
    B_pad = _round_up(B, block_b)

    # Lane-dense bf16 input slab: (T*I, B_pad), row = t*I + feature.
    x_slab = jnp.transpose(x, (1, 2, 0)).reshape(T * I, B)
    if B_pad != B:
        x_slab = jnp.pad(x_slab, ((0, 0), (0, B_pad - B)))
    x_slab = x_slab.astype(jnp.bfloat16)

    kp = _prepare_kernel_params(params, T, block_b)

    def _const_spec(a):
        # Whole array resident, same block for every grid step.
        return pl.BlockSpec(a.shape, lambda b, _nd=a.ndim: (0,) * _nd)

    out = pl.pallas_call(
        dnet_kernel,
        out_shape=jax.ShapeDtypeStruct((1, B_pad), jnp.float32),
        grid_spec=pltpu.PrefetchScalarGridSpec(
            num_scalar_prefetch=0,
            grid=(B_pad // block_b,),
            in_specs=[
                pl.BlockSpec((T * I, block_b), lambda b: (0, b)),
                _const_spec(kp["w_bd"]),
                _const_spec(kp["w_hh"]),
                _const_spec(kp["b"]),
                _const_spec(kp["w1"]),
                _const_spec(kp["b1"]),
                _const_spec(kp["w2"]),
                _const_spec(kp["b2"]),
            ],
            out_specs=pl.BlockSpec((1, block_b), lambda b: (0, b)),
        ),
        compiler_params=pltpu.CompilerParams(
            dimension_semantics=("parallel",)),
    )(x_slab, kp["w_bd"], kp["w_hh"], kp["b"],
      kp["w1"], kp["b1"], kp["w2"], kp["b2"])

    return out[:, :B].T                                          # (B, 1)


def init_params(key):
    """Deterministic init matching the PyTorch parameter shapes (f32, logical)."""
    ks = jax.random.split(key, 8)
    k_l = 1.0 / jnp.sqrt(jnp.float32(HIDDEN))
    w_ih = jax.random.uniform(ks[0], (4 * HIDDEN, SERIES_NUM), jnp.float32, -k_l, k_l)
    w_hh = jax.random.uniform(ks[1], (4 * HIDDEN, HIDDEN), jnp.float32, -k_l, k_l)
    b_ih = jax.random.uniform(ks[2], (4 * HIDDEN,), jnp.float32, -k_l, k_l)
    b_hh = jax.random.uniform(ks[3], (4 * HIDDEN,), jnp.float32, -k_l, k_l)
    k1 = 1.0 / jnp.sqrt(jnp.float32(HIDDEN))
    w1 = jax.random.uniform(ks[4], (MLP_HIDDEN, HIDDEN), jnp.float32, -k1, k1)
    b1 = jax.random.uniform(ks[5], (MLP_HIDDEN,), jnp.float32, -k1, k1)
    k2 = 1.0 / jnp.sqrt(jnp.float32(MLP_HIDDEN))
    w2 = jax.random.uniform(ks[6], (1, MLP_HIDDEN), jnp.float32, -k2, k2)
    b2 = jax.random.uniform(ks[7], (1,), jnp.float32, -k2, k2)
    return {"w_ih": w_ih, "w_hh": w_hh, "b_ih": b_ih, "b_hh": b_hh,
            "w1": w1, "b1": b1, "w2": w2, "b2": b2}


def dnet_reference(x, params):
    """Pure-JAX f32 reference with the exact PyTorch LSTM semantics."""
    B, T, I = x.shape
    H = HIDDEN
    w_ih, w_hh = params["w_ih"], params["w_hh"]
    b = params["b_ih"] + params["b_hh"]

    def step(carry, x_t):
        h, c = carry
        gates = x_t @ w_ih.T + h @ w_hh.T + b          # (B, 4H), order (i,f,g,o)
        i_g = jax.nn.sigmoid(gates[:, 0 * H:1 * H])
        f_g = jax.nn.sigmoid(gates[:, 1 * H:2 * H])
        g_g = jnp.tanh(gates[:, 2 * H:3 * H])
        o_g = jax.nn.sigmoid(gates[:, 3 * H:4 * H])
        c_new = f_g * c + i_g * g_g
        h_new = o_g * jnp.tanh(c_new)
        return (h_new, c_new), None

    h0 = jnp.zeros((B, H), jnp.float32)
    c0 = jnp.zeros((B, H), jnp.float32)
    (h_last, _), _ = lax.scan(step, (h0, c0), jnp.transpose(x, (1, 0, 2)))
    hid = jnp.maximum(h_last @ params["w1"].T + params["b1"], 0.0)
    return jax.nn.sigmoid(hid @ params["w2"].T + params["b2"])


if __name__ == "__main__":
    key = jax.random.PRNGKey(0)
    k_params, k_x = jax.random.split(key)

    B, T = 2, 8  # batch=2, seq=8, features=series_num=3
    x = jax.random.normal(k_x, (B, T, SERIES_NUM), jnp.float32)
    params = init_params(k_params)

    out = jax.block_until_ready(dnet_forward(x, params))
    ref = dnet_reference(x, params)

    assert out.shape == (B, 1)
    assert bool(jnp.all(jnp.isfinite(out)))
    # Kernel uses bf16 matmul operands (f32 accumulate) -> loose tolerance
    # against the pure-f32 reference.
    assert bool(jnp.allclose(out, ref, atol=2e-2, rtol=0.0)), (out, ref)
    print("KERNEL_OK")
</pallas_src>

<mosaic_0001>
module attributes {stable_mosaic.version = 11 : i64} {
  func.func @dnet_kernel(%arg0: i32, %arg1: memref<24x128xbf16, #tpu.memory_space<vmem>>, %arg2: memref<1024x24xbf16, #tpu.memory_space<vmem>>, %arg3: memref<128x32xbf16, #tpu.memory_space<vmem>>, %arg4: memref<128x128xf32, #tpu.memory_space<vmem>>, %arg5: memref<10x32xbf16, #tpu.memory_space<vmem>>, %arg6: memref<10x128xf32, #tpu.memory_space<vmem>>, %arg7: memref<1x10xbf16, #tpu.memory_space<vmem>>, %arg8: memref<1x128xf32, #tpu.memory_space<vmem>>, %arg9: memref<1x128xf32, #tpu.memory_space<vmem>>) attributes {dimension_semantics = [#tpu.dimension_semantics<parallel>], iteration_bounds = array<i64: 1>, scalar_prefetch = 0 : i64, scratch_operands = 0 : i64, tpu.core_type = #tpu.core_type<tc>, window_params = [{transform_indices = @transform_0, window_bounds = array<i64: 24, 128>}, {pipeline_mode = #tpu.pipeline_mode<synchronous>, transform_indices = @transform_1, window_bounds = array<i64: 1024, 24>}, {pipeline_mode = #tpu.pipeline_mode<synchronous>, transform_indices = @transform_2, window_bounds = array<i64: 128, 32>}, {pipeline_mode = #tpu.pipeline_mode<synchronous>, transform_indices = @transform_3, window_bounds = array<i64: 128, 128>}, {pipeline_mode = #tpu.pipeline_mode<synchronous>, transform_indices = @transform_4, window_bounds = array<i64: 10, 32>}, {pipeline_mode = #tpu.pipeline_mode<synchronous>, transform_indices = @transform_5, window_bounds = array<i64: 10, 128>}, {pipeline_mode = #tpu.pipeline_mode<synchronous>, transform_indices = @transform_6, window_bounds = array<i64: 1, 10>}, {pipeline_mode = #tpu.pipeline_mode<synchronous>, transform_indices = @transform_7, window_bounds = array<i64: 1, 128>}, {transform_indices = @transform_8, window_bounds = array<i64: 1, 128>}]} {
    %c0 = arith.constant 0 : index
    %c0_0 = arith.constant 0 : index
    %0 = vector.load %arg3[%c0, %c0_0] : memref<128x32xbf16, #tpu.memory_space<vmem>>, vector<128x32xbf16>
    %c0_1 = arith.constant 0 : index
    %c0_2 = arith.constant 0 : index
    %1 = vector.load %arg4[%c0_1, %c0_2] : memref<128x128xf32, #tpu.memory_space<vmem>>, vector<128x128xf32>
    %c0_3 = arith.constant 0 : index
    %c0_4 = arith.constant 0 : index
    %2 = vector.load %arg2[%c0_3, %c0_4] : memref<1024x24xbf16, #tpu.memory_space<vmem>>, vector<1024x24xbf16>
    %c0_5 = arith.constant 0 : index
    %c0_6 = arith.constant 0 : index
    %3 = vector.load %arg1[%c0_5, %c0_6] : memref<24x128xbf16, #tpu.memory_space<vmem>>, vector<24x128xbf16>
    %cst = arith.constant dense<0.000000e+00> : vector<1024x128xf32>
    %4 = tpu.matmul %2, %3, %cst {dimension_numbers = #tpu.dot_dimension_numbers<[1], [0], [0], [1], [0, 0, 1, 1], [], []>} : vector<1024x24xbf16>, vector<24x128xbf16>, vector<1024x128xf32> -> vector<1024x128xf32>
    %cst_7 = arith.constant 0.000000e+00 : f32
    %5 = vector.broadcast %cst_7 : f32 to vector<32x128xf32>
    %cst_8 = arith.constant 0.000000e+00 : f32
    %6 = vector.broadcast %cst_8 : f32 to vector<32x128xf32>
    %7 = vector.extract_strided_slice %4 {offsets = [0, 0], sizes = [128, 128], strides = [1, 1]} : vector<1024x128xf32> to vector<128x128xf32>
    %8 = arith.addf %7, %1 : vector<128x128xf32>
    %9 = arith.truncf %5 : vector<32x128xf32> to vector<32x128xbf16>
    %cst_9 = arith.constant dense<0.000000e+00> : vector<128x128xf32>
    %10 = tpu.matmul %0, %9, %cst_9 {dimension_numbers = #tpu.dot_dimension_numbers<[1], [0], [0], [1], [0, 0, 1, 1], [], []>} : vector<128x32xbf16>, vector<32x128xbf16>, vector<128x128xf32> -> vector<128x128xf32>
    %11 = arith.addf %8, %10 : vector<128x128xf32>
    %12 = math.tanh %11 : vector<128x128xf32>
    %13 = vector.extract_strided_slice %12 {offsets = [0, 0], sizes = [32, 128], strides = [1, 1]} : vector<128x128xf32> to vector<32x128xf32>
    %cst_10 = arith.constant 5.000000e-01 : f32
    %14 = vector.broadcast %cst_10 : f32 to vector<32x128xf32>
    %15 = arith.mulf %14, %13 : vector<32x128xf32>
    %cst_11 = arith.constant 5.000000e-01 : f32
    %16 = vector.broadcast %cst_11 : f32 to vector<32x128xf32>
    %17 = arith.addf %15, %16 : vector<32x128xf32>
    %18 = vector.extract_strided_slice %12 {offsets = [32, 0], sizes = [32, 128], strides = [1, 1]} : vector<128x128xf32> to vector<32x128xf32>
    %cst_12 = arith.constant 5.000000e-01 : f32
    %19 = vector.broadcast %cst_12 : f32 to vector<32x128xf32>
    %20 = arith.mulf %19, %18 : vector<32x128xf32>
    %cst_13 = arith.constant 5.000000e-01 : f32
    %21 = vector.broadcast %cst_13 : f32 to vector<32x128xf32>
    %22 = arith.addf %20, %21 : vector<32x128xf32>
    %23 = vector.extract_strided_slice %12 {offsets = [64, 0], sizes = [32, 128], strides = [1, 1]} : vector<128x128xf32> to vector<32x128xf32>
    %cst_14 = arith.constant 5.000000e-01 : f32
    %24 = vector.broadcast %cst_14 : f32 to vector<32x128xf32>
    %25 = arith.mulf %24, %23 : vector<32x128xf32>
    %cst_15 = arith.constant 5.000000e-01 : f32
    %26 = vector.broadcast %cst_15 : f32 to vector<32x128xf32>
    %27 = arith.addf %25, %26 : vector<32x128xf32>
    %28 = vector.extract_strided_slice %12 {offsets = [96, 0], sizes = [32, 128], strides = [1, 1]} : vector<128x128xf32> to vector<32x128xf32>
    %29 = arith.mulf %22, %6 : vector<32x128xf32>
    %30 = arith.mulf %17, %28 : vector<32x128xf32>
    %31 = arith.addf %29, %30 : vector<32x128xf32>
    %32 = math.tanh %31 : vector<32x128xf32>
    %33 = arith.mulf %27, %32 : vector<32x128xf32>
    %34 = vector.extract_strided_slice %4 {offsets = [128, 0], sizes = [128, 128], strides = [1, 1]} : vector<1024x128xf32> to vector<128x128xf32>
    %35 = arith.addf %34, %1 : vector<128x128xf32>
    %36 = arith.truncf %33 : vector<32x128xf32> to vector<32x128xbf16>
    %cst_16 = arith.constant dense<0.000000e+00> : vector<128x128xf32>
    %37 = tpu.matmul %0, %36, %cst_16 {dimension_numbers = #tpu.dot_dimension_numbers<[1], [0], [0], [1], [0, 0, 1, 1], [], []>} : vector<128x32xbf16>, vector<32x128xbf16>, vector<128x128xf32> -> vector<128x128xf32>
    %38 = arith.addf %35, %37 : vector<128x128xf32>
    %39 = math.tanh %38 : vector<128x128xf32>
    %40 = vector.extract_strided_slice %39 {offsets = [0, 0], sizes = [32, 128], strides = [1, 1]} : vector<128x128xf32> to vector<32x128xf32>
    %cst_17 = arith.constant 5.000000e-01 : f32
    %41 = vector.broadcast %cst_17 : f32 to vector<32x128xf32>
    %42 = arith.mulf %41, %40 : vector<32x128xf32>
    %cst_18 = arith.constant 5.000000e-01 : f32
    %43 = vector.broadcast %cst_18 : f32 to vector<32x128xf32>
    %44 = arith.addf %42, %43 : vector<32x128xf32>
    %45 = vector.extract_strided_slice %39 {offsets = [32, 0], sizes = [32, 128], strides = [1, 1]} : vector<128x128xf32> to vector<32x128xf32>
    %cst_19 = arith.constant 5.000000e-01 : f32
    %46 = vector.broadcast %cst_19 : f32 to vector<32x128xf32>
    %47 = arith.mulf %46, %45 : vector<32x128xf32>
    %cst_20 = arith.constant 5.000000e-01 : f32
    %48 = vector.broadcast %cst_20 : f32 to vector<32x128xf32>
    %49 = arith.addf %47, %48 : vector<32x128xf32>
    %50 = vector.extract_strided_slice %39 {offsets = [64, 0], sizes = [32, 128], strides = [1, 1]} : vector<128x128xf32> to vector<32x128xf32>
    %cst_21 = arith.constant 5.000000e-01 : f32
    %51 = vector.broadcast %cst_21 : f32 to vector<32x128xf32>
    %52 = arith.mulf %51, %50 : vector<32x128xf32>
    %cst_22 = arith.constant 5.000000e-01 : f32
    %53 = vector.broadcast %cst_22 : f32 to vector<32x128xf32>
    %54 = arith.addf %52, %53 : vector<32x128xf32>
    %55 = vector.extract_strided_slice %39 {offsets = [96, 0], sizes = [32, 128], strides = [1, 1]} : vector<128x128xf32> to vector<32x128xf32>
    %56 = arith.mulf %49, %31 : vector<32x128xf32>
    %57 = arith.mulf %44, %55 : vector<32x128xf32>
    %58 = arith.addf %56, %57 : vector<32x128xf32>
    %59 = math.tanh %58 : vector<32x128xf32>
    %60 = arith.mulf %54, %59 : vector<32x128xf32>
    %61 = vector.extract_strided_slice %4 {offsets = [256, 0], sizes = [128, 128], strides = [1, 1]} : vector<1024x128xf32> to vector<128x128xf32>
    %62 = arith.addf %61, %1 : vector<128x128xf32>
    %63 = arith.truncf %60 : vector<32x128xf32> to vector<32x128xbf16>
    %cst_23 = arith.constant dense<0.000000e+00> : vector<128x128xf32>
    %64 = tpu.matmul %0, %63, %cst_23 {dimension_numbers = #tpu.dot_dimension_numbers<[1], [0], [0], [1], [0, 0, 1, 1], [], []>} : vector<128x32xbf16>, vector<32x128xbf16>, vector<128x128xf32> -> vector<128x128xf32>
    %65 = arith.addf %62, %64 : vector<128x128xf32>
    %66 = math.tanh %65 : vector<128x128xf32>
    %67 = vector.extract_strided_slice %66 {offsets = [0, 0], sizes = [32, 128], strides = [1, 1]} : vector<128x128xf32> to vector<32x128xf32>
    %cst_24 = arith.constant 5.000000e-01 : f32
    %68 = vector.broadcast %cst_24 : f32 to vector<32x128xf32>
    %69 = arith.mulf %68, %67 : vector<32x128xf32>
    %cst_25 = arith.constant 5.000000e-01 : f32
    %70 = vector.broadcast %cst_25 : f32 to vector<32x128xf32>
    %71 = arith.addf %69, %70 : vector<32x128xf32>
    %72 = vector.extract_strided_slice %66 {offsets = [32, 0], sizes = [32, 128], strides = [1, 1]} : vector<128x128xf32> to vector<32x128xf32>
    %cst_26 = arith.constant 5.000000e-01 : f32
    %73 = vector.broadcast %cst_26 : f32 to vector<32x128xf32>
    %74 = arith.mulf %73, %72 : vector<32x128xf32>
    %cst_27 = arith.constant 5.000000e-01 : f32
    %75 = vector.broadcast %cst_27 : f32 to vector<32x128xf32>
    %76 = arith.addf %74, %75 : vector<32x128xf32>
    %77 = vector.extract_strided_slice %66 {offsets = [64, 0], sizes = [32, 128], strides = [1, 1]} : vector<128x128xf32> to vector<32x128xf32>
    %cst_28 = arith.constant 5.000000e-01 : f32
    %78 = vector.broadcast %cst_28 : f32 to vector<32x128xf32>
    %79 = arith.mulf %78, %77 : vector<32x128xf32>
    %cst_29 = arith.constant 5.000000e-01 : f32
    %80 = vector.broadcast %cst_29 : f32 to vector<32x128xf32>
    %81 = arith.addf %79, %80 : vector<32x128xf32>
    %82 = vector.extract_strided_slice %66 {offsets = [96, 0], sizes = [32, 128], strides = [1, 1]} : vector<128x128xf32> to vector<32x128xf32>
    %83 = arith.mulf %76, %58 : vector<32x128xf32>
    %84 = arith.mulf %71, %82 : vector<32x128xf32>
    %85 = arith.addf %83, %84 : vector<32x128xf32>
    %86 = math.tanh %85 : vector<32x128xf32>
    %87 = arith.mulf %81, %86 : vector<32x128xf32>
    %88 = vector.extract_strided_slice %4 {offsets = [384, 0], sizes = [128, 128], strides = [1, 1]} : vector<1024x128xf32> to vector<128x128xf32>
    %89 = arith.addf %88, %1 : vector<128x128xf32>
    %90 = arith.truncf %87 : vector<32x128xf32> to vector<32x128xbf16>
    %cst_30 = arith.constant dense<0.000000e+00> : vector<128x128xf32>
    %91 = tpu.matmul %0, %90, %cst_30 {dimension_numbers = #tpu.dot_dimension_numbers<[1], [0], [0], [1], [0, 0, 1, 1], [], []>} : vector<128x32xbf16>, vector<32x128xbf16>, vector<128x128xf32> -> vector<128x128xf32>
    %92 = arith.addf %89, %91 : vector<128x128xf32>
    %93 = math.tanh %92 : vector<128x128xf32>
    %94 = vector.extract_strided_slice %93 {offsets = [0, 0], sizes = [32, 128], strides = [1, 1]} : vector<128x128xf32> to vector<32x128xf32>
    %cst_31 = arith.constant 5.000000e-01 : f32
    %95 = vector.broadcast %cst_31 : f32 to vector<32x128xf32>
    %96 = arith.mulf %95, %94 : vector<32x128xf32>
    %cst_32 = arith.constant 5.000000e-01 : f32
    %97 = vector.broadcast %cst_32 : f32 to vector<32x128xf32>
    %98 = arith.addf %96, %97 : vector<32x128xf32>
    %99 = vector.extract_strided_slice %93 {offsets = [32, 0], sizes = [32, 128], strides = [1, 1]} : vector<128x128xf32> to vector<32x128xf32>
    %cst_33 = arith.constant 5.000000e-01 : f32
    %100 = vector.broadcast %cst_33 : f32 to vector<32x128xf32>
    %101 = arith.mulf %100, %99 : vector<32x128xf32>
    %cst_34 = arith.constant 5.000000e-01 : f32
    %102 = vector.broadcast %cst_34 : f32 to vector<32x128xf32>
    %103 = arith.addf %101, %102 : vector<32x128xf32>
    %104 = vector.extract_strided_slice %93 {offsets = [64, 0], sizes = [32, 128], strides = [1, 1]} : vector<128x128xf32> to vector<32x128xf32>
    %cst_35 = arith.constant 5.000000e-01 : f32
    %105 = vector.broadcast %cst_35 : f32 to vector<32x128xf32>
    %106 = arith.mulf %105, %104 : vector<32x128xf32>
    %cst_36 = arith.constant 5.000000e-01 : f32
    %107 = vector.broadcast %cst_36 : f32 to vector<32x128xf32>
    %108 = arith.addf %106, %107 : vector<32x128xf32>
    %109 = vector.extract_strided_slice %93 {offsets = [96, 0], sizes = [32, 128], strides = [1, 1]} : vector<128x128xf32> to vector<32x128xf32>
    %110 = arith.mulf %103, %85 : vector<32x128xf32>
    %111 = arith.mulf %98, %109 : vector<32x128xf32>
    %112 = arith.addf %110, %111 : vector<32x128xf32>
    %113 = math.tanh %112 : vector<32x128xf32>
    %114 = arith.mulf %108, %113 : vector<32x128xf32>
    %115 = vector.extract_strided_slice %4 {offsets = [512, 0], sizes = [128, 128], strides = [1, 1]} : vector<1024x128xf32> to vector<128x128xf32>
    %116 = arith.addf %115, %1 : vector<128x128xf32>
    %117 = arith.truncf %114 : vector<32x128xf32> to vector<32x128xbf16>
    %cst_37 = arith.constant dense<0.000000e+00> : vector<128x128xf32>
    %118 = tpu.matmul %0, %117, %cst_37 {dimension_numbers = #tpu.dot_dimension_numbers<[1], [0], [0], [1], [0, 0, 1, 1], [], []>} : vector<128x32xbf16>, vector<32x128xbf16>, vector<128x128xf32> -> vector<128x128xf32>
    %119 = arith.addf %116, %118 : vector<128x128xf32>
    %120 = math.tanh %119 : vector<128x128xf32>
    %121 = vector.extract_strided_slice %120 {offsets = [0, 0], sizes = [32, 128], strides = [1, 1]} : vector<128x128xf32> to vector<32x128xf32>
    %cst_38 = arith.constant 5.000000e-01 : f32
    %122 = vector.broadcast %cst_38 : f32 to vector<32x128xf32>
    %123 = arith.mulf %122, %121 : vector<32x128xf32>
    %cst_39 = arith.constant 5.000000e-01 : f32
    %124 = vector.broadcast %cst_39 : f32 to vector<32x128xf32>
    %125 = arith.addf %123, %124 : vector<32x128xf32>
    %126 = vector.extract_strided_slice %120 {offsets = [32, 0], sizes = [32, 128], strides = [1, 1]} : vector<128x128xf32> to vector<32x128xf32>
    %cst_40 = arith.constant 5.000000e-01 : f32
    %127 = vector.broadcast %cst_40 : f32 to vector<32x128xf32>
    %128 = arith.mulf %127, %126 : vector<32x128xf32>
    %cst_41 = arith.constant 5.000000e-01 : f32
    %129 = vector.broadcast %cst_41 : f32 to vector<32x128xf32>
    %130 = arith.addf %128, %129 : vector<32x128xf32>
    %131 = vector.extract_strided_slice %120 {offsets = [64, 0], sizes = [32, 128], strides = [1, 1]} : vector<128x128xf32> to vector<32x128xf32>
    %cst_42 = arith.constant 5.000000e-01 : f32
    %132 = vector.broadcast %cst_42 : f32 to vector<32x128xf32>
    %133 = arith.mulf %132, %131 : vector<32x128xf32>
    %cst_43 = arith.constant 5.000000e-01 : f32
    %134 = vector.broadcast %cst_43 : f32 to vector<32x128xf32>
    %135 = arith.addf %133, %134 : vector<32x128xf32>
    %136 = vector.extract_strided_slice %120 {offsets = [96, 0], sizes = [32, 128], strides = [1, 1]} : vector<128x128xf32> to vector<32x128xf32>
    %137 = arith.mulf %130, %112 : vector<32x128xf32>
    %138 = arith.mulf %125, %136 : vector<32x128xf32>
    %139 = arith.addf %137, %138 : vector<32x128xf32>
    %140 = math.tanh %139 : vector<32x128xf32>
    %141 = arith.mulf %135, %140 : vector<32x128xf32>
    %142 = vector.extract_strided_slice %4 {offsets = [640, 0], sizes = [128, 128], strides = [1, 1]} : vector<1024x128xf32> to vector<128x128xf32>
    %143 = arith.addf %142, %1 : vector<128x128xf32>
    %144 = arith.truncf %141 : vector<32x128xf32> to vector<32x128xbf16>
    %cst_44 = arith.constant dense<0.000000e+00> : vector<128x128xf32>
    %145 = tpu.matmul %0, %144, %cst_44 {dimension_numbers = #tpu.dot_dimension_numbers<[1], [0], [0], [1], [0, 0, 1, 1], [], []>} : vector<128x32xbf16>, vector<32x128xbf16>, vector<128x128xf32> -> vector<128x128xf32>
    %146 = arith.addf %143, %145 : vector<128x128xf32>
    %147 = math.tanh %146 : vector<128x128xf32>
    %148 = vector.extract_strided_slice %147 {offsets = [0, 0], sizes = [32, 128], strides = [1, 1]} : vector<128x128xf32> to vector<32x128xf32>
    %cst_45 = arith.constant 5.000000e-01 : f32
    %149 = vector.broadcast %cst_45 : f32 to vector<32x128xf32>
    %150 = arith.mulf %149, %148 : vector<32x128xf32>
    %cst_46 = arith.constant 5.000000e-01 : f32
    %151 = vector.broadcast %cst_46 : f32 to vector<32x128xf32>
    %152 = arith.addf %150, %151 : vector<32x128xf32>
    %153 = vector.extract_strided_slice %147 {offsets = [32, 0], sizes = [32, 128], strides = [1, 1]} : vector<128x128xf32> to vector<32x128xf32>
    %cst_47 = arith.constant 5.000000e-01 : f32
    %154 = vector.broadcast %cst_47 : f32 to vector<32x128xf32>
    %155 = arith.mulf %154, %153 : vector<32x128xf32>
    %cst_48 = arith.constant 5.000000e-01 : f32
    %156 = vector.broadcast %cst_48 : f32 to vector<32x128xf32>
    %157 = arith.addf %155, %156 : vector<32x128xf32>
    %158 = vector.extract_strided_slice %147 {offsets = [64, 0], sizes = [32, 128], strides = [1, 1]} : vector<128x128xf32> to vector<32x128xf32>
    %cst_49 = arith.constant 5.000000e-01 : f32
    %159 = vector.broadcast %cst_49 : f32 to vector<32x128xf32>
    %160 = arith.mulf %159, %158 : vector<32x128xf32>
    %cst_50 = arith.constant 5.000000e-01 : f32
    %161 = vector.broadcast %cst_50 : f32 to vector<32x128xf32>
    %162 = arith.addf %160, %161 : vector<32x128xf32>
    %163 = vector.extract_strided_slice %147 {offsets = [96, 0], sizes = [32, 128], strides = [1, 1]} : vector<128x128xf32> to vector<32x128xf32>
    %164 = arith.mulf %157, %139 : vector<32x128xf32>
    %165 = arith.mulf %152, %163 : vector<32x128xf32>
    %166 = arith.addf %164, %165 : vector<32x128xf32>
    %167 = math.tanh %166 : vector<32x128xf32>
    %168 = arith.mulf %162, %167 : vector<32x128xf32>
    %169 = vector.extract_strided_slice %4 {offsets = [768, 0], sizes = [128, 128], strides = [1, 1]} : vector<1024x128xf32> to vector<128x128xf32>
    %170 = arith.addf %169, %1 : vector<128x128xf32>
    %171 = arith.truncf %168 : vector<32x128xf32> to vector<32x128xbf16>
    %cst_51 = arith.constant dense<0.000000e+00> : vector<128x128xf32>
    %172 = tpu.matmul %0, %171, %cst_51 {dimension_numbers = #tpu.dot_dimension_numbers<[1], [0], [0], [1], [0, 0, 1, 1], [], []>} : vector<128x32xbf16>, vector<32x128xbf16>, vector<128x128xf32> -> vector<128x128xf32>
    %173 = arith.addf %170, %172 : vector<128x128xf32>
    %174 = math.tanh %173 : vector<128x128xf32>
    %175 = vector.extract_strided_slice %174 {offsets = [0, 0], sizes = [32, 128], strides = [1, 1]} : vector<128x128xf32> to vector<32x128xf32>
    %cst_52 = arith.constant 5.000000e-01 : f32
    %176 = vector.broadcast %cst_52 : f32 to vector<32x128xf32>
    %177 = arith.mulf %176, %175 : vector<32x128xf32>
    %cst_53 = arith.constant 5.000000e-01 : f32
    %178 = vector.broadcast %cst_53 : f32 to vector<32x128xf32>
    %179 = arith.addf %177, %178 : vector<32x128xf32>
    %180 = vector.extract_strided_slice %174 {offsets = [32, 0], sizes = [32, 128], strides = [1, 1]} : vector<128x128xf32> to vector<32x128xf32>
    %cst_54 = arith.constant 5.000000e-01 : f32
    %181 = vector.broadcast %cst_54 : f32 to vector<32x128xf32>
    %182 = arith.mulf %181, %180 : vector<32x128xf32>
    %cst_55 = arith.constant 5.000000e-01 : f32
    %183 = vector.broadcast %cst_55 : f32 to vector<32x128xf32>
    %184 = arith.addf %182, %183 : vector<32x128xf32>
    %185 = vector.extract_strided_slice %174 {offsets = [64, 0], sizes = [32, 128], strides = [1, 1]} : vector<128x128xf32> to vector<32x128xf32>
    %cst_56 = arith.constant 5.000000e-01 : f32
    %186 = vector.broadcast %cst_56 : f32 to vector<32x128xf32>
    %187 = arith.mulf %186, %185 : vector<32x128xf32>
    %cst_57 = arith.constant 5.000000e-01 : f32
    %188 = vector.broadcast %cst_57 : f32 to vector<32x128xf32>
    %189 = arith.addf %187, %188 : vector<32x128xf32>
    %190 = vector.extract_strided_slice %174 {offsets = [96, 0], sizes = [32, 128], strides = [1, 1]} : vector<128x128xf32> to vector<32x128xf32>
    %191 = arith.mulf %184, %166 : vector<32x128xf32>
    %192 = arith.mulf %179, %190 : vector<32x128xf32>
    %193 = arith.addf %191, %192 : vector<32x128xf32>
    %194 = math.tanh %193 : vector<32x128xf32>
    %195 = arith.mulf %189, %194 : vector<32x128xf32>
    %196 = vector.extract_strided_slice %4 {offsets = [896, 0], sizes = [128, 128], strides = [1, 1]} : vector<1024x128xf32> to vector<128x128xf32>
    %197 = arith.addf %196, %1 : vector<128x128xf32>
    %198 = arith.truncf %195 : vector<32x128xf32> to vector<32x128xbf16>
    %cst_58 = arith.constant dense<0.000000e+00> : vector<128x128xf32>
    %199 = tpu.matmul %0, %198, %cst_58 {dimension_numbers = #tpu.dot_dimension_numbers<[1], [0], [0], [1], [0, 0, 1, 1], [], []>} : vector<128x32xbf16>, vector<32x128xbf16>, vector<128x128xf32> -> vector<128x128xf32>
    %200 = arith.addf %197, %199 : vector<128x128xf32>
    %201 = math.tanh %200 : vector<128x128xf32>
    %202 = vector.extract_strided_slice %201 {offsets = [0, 0], sizes = [32, 128], strides = [1, 1]} : vector<128x128xf32> to vector<32x128xf32>
    %cst_59 = arith.constant 5.000000e-01 : f32
    %203 = vector.broadcast %cst_59 : f32 to vector<32x128xf32>
    %204 = arith.mulf %203, %202 : vector<32x128xf32>
    %cst_60 = arith.constant 5.000000e-01 : f32
    %205 = vector.broadcast %cst_60 : f32 to vector<32x128xf32>
    %206 = arith.addf %204, %205 : vector<32x128xf32>
    %207 = vector.extract_strided_slice %201 {offsets = [32, 0], sizes = [32, 128], strides = [1, 1]} : vector<128x128xf32> to vector<32x128xf32>
    %cst_61 = arith.constant 5.000000e-01 : f32
    %208 = vector.broadcast %cst_61 : f32 to vector<32x128xf32>
    %209 = arith.mulf %208, %207 : vector<32x128xf32>
    %cst_62 = arith.constant 5.000000e-01 : f32
    %210 = vector.broadcast %cst_62 : f32 to vector<32x128xf32>
    %211 = arith.addf %209, %210 : vector<32x128xf32>
    %212 = vector.extract_strided_slice %201 {offsets = [64, 0], sizes = [32, 128], strides = [1, 1]} : vector<128x128xf32> to vector<32x128xf32>
    %cst_63 = arith.constant 5.000000e-01 : f32
    %213 = vector.broadcast %cst_63 : f32 to vector<32x128xf32>
    %214 = arith.mulf %213, %212 : vector<32x128xf32>
    %cst_64 = arith.constant 5.000000e-01 : f32
    %215 = vector.broadcast %cst_64 : f32 to vector<32x128xf32>
    %216 = arith.addf %214, %215 : vector<32x128xf32>
    %217 = vector.extract_strided_slice %201 {offsets = [96, 0], sizes = [32, 128], strides = [1, 1]} : vector<128x128xf32> to vector<32x128xf32>
    %218 = arith.mulf %211, %193 : vector<32x128xf32>
    %219 = arith.mulf %206, %217 : vector<32x128xf32>
    %220 = arith.addf %218, %219 : vector<32x128xf32>
    %221 = math.tanh %220 : vector<32x128xf32>
    %222 = arith.mulf %216, %221 : vector<32x128xf32>
    %c0_65 = arith.constant 0 : index
    %c0_66 = arith.constant 0 : index
    %223 = vector.load %arg5[%c0_65, %c0_66] : memref<10x32xbf16, #tpu.memory_space<vmem>>, vector<10x32xbf16>
    %224 = arith.truncf %222 : vector<32x128xf32> to vector<32x128xbf16>
    %cst_67 = arith.constant dense<0.000000e+00> : vector<10x128xf32>
    %225 = tpu.matmul %223, %224, %cst_67 {dimension_numbers = #tpu.dot_dimension_numbers<[1], [0], [0], [1], [0, 0, 1, 1], [], []>} : vector<10x32xbf16>, vector<32x128xbf16>, vector<10x128xf32> -> vector<10x128xf32>
    %c0_68 = arith.constant 0 : index
    %c0_69 = arith.constant 0 : index
    %226 = vector.load %arg6[%c0_68, %c0_69] : memref<10x128xf32, #tpu.memory_space<vmem>>, vector<10x128xf32>
    %227 = arith.addf %225, %226 : vector<10x128xf32>
    %cst_70 = arith.constant 0.000000e+00 : f32
    %228 = vector.broadcast %cst_70 : f32 to vector<10x128xf32>
    %229 = arith.maximumf %227, %228 : vector<10x128xf32>
    %c0_71 = arith.constant 0 : index
    %c0_72 = arith.constant 0 : index
    %230 = vector.load %arg7[%c0_71, %c0_72] : memref<1x10xbf16, #tpu.memory_space<vmem>>, vector<1x10xbf16>
    %231 = arith.truncf %229 : vector<10x128xf32> to vector<10x128xbf16>
    %cst_73 = arith.constant dense<0.000000e+00> : vector<1x128xf32>
    %232 = tpu.matmul %230, %231, %cst_73 {dimension_numbers = #tpu.dot_dimension_numbers<[1], [0], [0], [1], [0, 0, 1, 1], [], []>} : vector<1x10xbf16>, vector<10x128xbf16>, vector<1x128xf32> -> vector<1x128xf32>
    %c0_74 = arith.constant 0 : index
    %c0_75 = arith.constant 0 : index
    %233 = vector.load %arg8[%c0_74, %c0_75] : memref<1x128xf32, #tpu.memory_space<vmem>>, vector<1x128xf32>
    %234 = arith.addf %232, %233 : vector<1x128xf32>
    %235 = arith.negf %234 : vector<1x128xf32>
    %236 = math.exp %235 : vector<1x128xf32>
    %cst_76 = arith.constant 1.000000e+00 : f32
    %237 = vector.broadcast %cst_76 : f32 to vector<1x128xf32>
    %238 = arith.addf %237, %236 : vector<1x128xf32>
    %239 = arith.divf %237, %238 : vector<1x128xf32>
    %c0_77 = arith.constant 0 : index
    %c0_78 = arith.constant 0 : index
    %240 = vector.load %arg9[%c0_77, %c0_78] : memref<1x128xf32, #tpu.memory_space<vmem>>, vector<1x128xf32>
    tpu.vector_store %arg9[%c0_77, %c0_78], %239 {strides = array<i32>} : memref<1x128xf32, #tpu.memory_space<vmem>>, vector<1x128xf32>,
    return
  }
  func.func @transform_0(%arg0: i32) -> (i32, i32) {
    %c0_i32 = arith.constant 0 : i32
    %c0_i32_0 = arith.constant 0 : i32
    return %c0_i32, %arg0 : i32, i32
  }
  func.func @transform_1(%arg0: i32) -> (i32, i32) {
    %c0_i32 = arith.constant 0 : i32
    %c0_i32_0 = arith.constant 0 : i32
    %c0_i32_1 = arith.constant 0 : i32
    return %c0_i32, %c0_i32_0 : i32, i32
  }
  func.func @transform_2(%arg0: i32) -> (i32, i32) {
    %c0_i32 = arith.constant 0 : i32
    %c0_i32_0 = arith.constant 0 : i32
    %c0_i32_1 = arith.constant 0 : i32
    return %c0_i32, %c0_i32_0 : i32, i32
  }
  func.func @transform_3(%arg0: i32) -> (i32, i32) {
    %c0_i32 = arith.constant 0 : i32
    %c0_i32_0 = arith.constant 0 : i32
    %c0_i32_1 = arith.constant 0 : i32
    return %c0_i32, %c0_i32_0 : i32, i32
  }
  func.func @transform_4(%arg0: i32) -> (i32, i32) {
    %c0_i32 = arith.constant 0 : i32
    %c0_i32_0 = arith.constant 0 : i32
    %c0_i32_1 = arith.constant 0 : i32
    return %c0_i32, %c0_i32_0 : i32, i32
  }
  func.func @transform_5(%arg0: i32) -> (i32, i32) {
    %c0_i32 = arith.constant 0 : i32
    %c0_i32_0 = arith.constant 0 : i32
    %c0_i32_1 = arith.constant 0 : i32
    return %c0_i32, %c0_i32_0 : i32, i32
  }
  func.func @transform_6(%arg0: i32) -> (i32, i32) {
    %c0_i32 = arith.constant 0 : i32
    %c0_i32_0 = arith.constant 0 : i32
    %c0_i32_1 = arith.constant 0 : i32
    return %c0_i32, %c0_i32_0 : i32, i32
  }
  func.func @transform_7(%arg0: i32) -> (i32, i32) {
    %c0_i32 = arith.constant 0 : i32
    %c0_i32_0 = arith.constant 0 : i32
    %c0_i32_1 = arith.constant 0 : i32
    return %c0_i32, %c0_i32_0 : i32, i32
  }
  func.func @transform_8(%arg0: i32) -> (i32, i32) {
    %c0_i32 = arith.constant 0 : i32
    %c0_i32_0 = arith.constant 0 : i32
    return %c0_i32, %arg0 : i32, i32
  }
}

</mosaic_0001>

<bundles_post_ra>
// kernel: tpu_custom_call.1
= control target key start
LH: loop header
LB: loop body
LE: loop exit
PB: predicated region body
PF: predicated region fallthrough
CT: control target
= control target key end

     0   :  { %vm716_vm0 = vcmask 1043456   ;;  %v4119_v1 = vmov 0   ;;  %vm1321_vm1 = vcmask 261120   ;;  %vm523_vm2 = vcmask 195584   ;;  %s5263_s0 = inlined_call_operand.vmem [shape: bf16[24,128], index: 0, kind: input, shape index: {}]   ;;  %s5264_s1 = inlined_call_operand.vmem [shape: bf16[1024,24], index: 1, kind: input, shape index: {}]   ;;  %s5265_s2 = inlined_call_operand.vmem [shape: bf16[128,32], index: 2, kind: input, shape index: {}]   ;;  %s5266_s3 = inlined_call_operand.vmem [shape: f32[128,128], index: 3, kind: input, shape index: {}]   ;;  %s5267_s4 = inlined_call_operand.vmem [shape: bf16[10,32], index: 4, kind: input, shape index: {}]   ;;  %s5268_s5 = inlined_call_operand.vmem [shape: f32[10,128], index: 5, kind: input, shape index: {}]   ;;  %s5269_s6 = inlined_call_operand.vmem [shape: bf16[1,10], index: 6, kind: input, shape index: {}]   ;;  %s5270_s7 = inlined_call_operand.vmem [shape: f32[1,128], index: 7, kind: input, shape index: {}]   ;;  %s5271_s8 = inlined_call_operand.hbm [shape: f32[1,128], index: 8, kind: output, shape index: {}]  }
   0x1   :  { %v3650_v0 = vld [vmem:[%s5263_s0 + $0x8] ss:$0 sps:$4 sm:$0xff]   ;;  %3473 = vmatprep.subr.bf16.mxu1 %v4119_v1  ;;  %v4174_v2 = vld [vmem:[%s5265_s2] sm:$0xff]   ;;  %v4198_v8 = vld [vmem:[%s5265_s2 + $0x10] sm:$0xff]  }
   0x2   :  { %3645 = vmatprep.subr.msk.bf16.mxu0 %vm716_vm0, %v3650_v0  ;;  %v718_v3 = vsel %vm716_vm0, %v3650_v0, 0  ;;  %3474 = vmatpush3.bf16.msra.mxu1 %v4119_v1  ;;  %v3652_v4 = vld [vmem:[%s5263_s0] sm:$0xff]   ;;  %v4184_v5 = vld [vmem:[%s5265_s2 + $0x8] sm:$0xff]   ;;  %v3658_v9 = vld [vmem:[%s5264_s1 + $0x10] sm:$0xff]  }
   0x3   :  { %3342 = vmatpush3.bf16.msra.mxu0 %v718_v3  ;;  %3475 = vmatprep.mubr.msk.bf16.mxu1 %vm1321_vm1, %v4174_v2  ;;  %v3654_v6 = vld [vmem:[%s5264_s1] sm:$0xff]   ;;  %v3655_v7 = vld [vmem:[%s5264_s1 + $0x8] sm:$0xff]   ;;  %v4208_v10 = vld [vmem:[%s5265_s2 + $0x18] sm:$0xff]  }
   0x4   :  { %3343 = vmatprep.subr.bf16.mxu0 %v3652_v4  ;;  %3345 = vmatprep.mubr.msk.bf16.mxu0 %vm523_vm2, %v3654_v6  ;;  %v4214_v11 = vld [vmem:[%s5265_s2 + $0x20] sm:$0xff]   ;;  %v3659_v12 = vld [vmem:[%s5264_s1 + $0x18] sm:$0xff]   ;;  %v4230_v14 = vld [vmem:[%s5265_s2 + $0x28] sm:$0xff]  }
   0x5   :  { %3476 = vmatmul.mubr.msk.bf16.vlgmr.msra.gmra.mxu1 %vm1321_vm1, %v4184_v5  ;;  %v3662_v13 = vld [vmem:[%s5264_s1 + $0x20] sm:$0xff]   ;;  %v4235_v15 = vld [vmem:[%s5265_s2 + $0x30] sm:$0xff]   ;;  %v3663_v16 = vld [vmem:[%s5264_s1 + $0x28] sm:$0xff]  }
   0x6   :  { %3479 = vmatprep.mubr.msk.bf16.mxu1 %vm1321_vm1, %v4198_v8  ;;  %v3666_v17 = vld [vmem:[%s5264_s1 + $0x30] sm:$0xff]   ;;  %v4252_v18 = vld [vmem:[%s5265_s2 + $0x38] sm:$0xff]  }
   0x7   :  { %3344 = vmatpush3.bf16.msra.mxu0 %v3652_v4  ;;  %v3667_v19 = vld [vmem:[%s5264_s1 + $0x38] sm:$0xff]  }
   0xa   :  { %3346 = vmatmul.mubr.msk.bf16.vlgmr.msra.gmra.mxu0 %vm523_vm2, %v3655_v7 }
   0xb   :  { %3349 = vmatprep.mubr.msk.bf16.mxu0 %vm523_vm2, %v3658_v9 }
   0xd   :  { %3480 = vmatmul.mubr.msk.bf16.gmra.mxu1 %vm1321_vm1, %v4208_v10 }
   0xe   :  { %3483 = vmatprep.mubr.msk.bf16.mxu1 %vm1321_vm1, %v4214_v11 }
  0x12   :  { %3350 = vmatmul.mubr.msk.bf16.gmra.mxu0 %vm523_vm2, %v3659_v12 }
  0x13   :  { %3353 = vmatprep.mubr.msk.bf16.mxu0 %vm523_vm2, %v3662_v13 }
  0x15   :  { %3484 = vmatmul.mubr.msk.bf16.gmra.mxu1 %vm1321_vm1, %v4230_v14 }
  0x16   :  { %3487 = vmatprep.mubr.msk.bf16.mxu1 %vm1321_vm1, %v4235_v15 }
  0x1a   :  { %3354 = vmatmul.mubr.msk.bf16.gmra.mxu0 %vm523_vm2, %v3663_v16 }
  0x1b   :  { %3357 = vmatprep.mubr.msk.bf16.mxu0 %vm523_vm2, %v3666_v17 }
  0x1d   :  { %3488 = vmatmul.mubr.msk.bf16.gmra.mxu1 %vm1321_vm1, %v4252_v18 }
  0x1e   :  { %3495 = vmatprep.mubr.msk.bf16.mxu1 %vm1321_vm1, %v4174_v2 }
  0x22   :  { %3358 = vmatmul.mubr.msk.bf16.gmra.mxu0 %vm523_vm2, %v3667_v19 }
  0x23   :  { %13 = vsyncpa [#allocation3], 0  ;;  %v3668_v20 = vld [vmem:[%s5264_s1 + $0x40] sm:$0xff]   ;;  %v3669_v21 = vld [vmem:[%s5264_s1 + $0x48] sm:$0xff]   ;;  %vm4121_vm3 = vmmov 0   ;;  %vm2920_vm4 = vcmask 1044480  }
  0x24   :  { %3361 = vmatprep.mubr.msk.bf16.mxu0 %vm523_vm2, %v3668_v20  ;;  %v3670_v22 = vld [vmem:[%s5264_s1 + $0x50] sm:$0xff]   ;;  %v3671_v23 = vld [vmem:[%s5264_s1 + $0x58] sm:$0xff]   ;;  %v3672_v24 = vld [vmem:[%s5264_s1 + $0x60] sm:$0xff]   ;;  %vm2916_vm5 = vcmask 80896  }
  0x25   :  { %v3673_v25 = vld [vmem:[%s5264_s1 + $0x68] sm:$0xff]   ;;  %v3674_v26 = vld [vmem:[%s5264_s1 + $0x70] sm:$0xff]   ;;  %v3675_v27 = vld [vmem:[%s5264_s1 + $0x78] sm:$0xff]  }
  0x26   :  { %v4299_v39 = vld [vmem:[%s5266_s3 + $0x30] sm:$0xff]  ;;  %v4310_v45 = vld [vmem:[%s5266_s3 + $0x20] sm:$0xff]  ;;  %v4317_v47 = vld [vmem:[%s5266_s3 + $0x38] sm:$0xff] }
  0x27   :  { %v4304_v42 = vld [vmem:[%s5266_s3 + $0x10] sm:$0xff]  ;;  %v4323_v50 = vld [vmem:[%s5266_s3] sm:$0xff]  ;;  %v4330_v52 = vld [vmem:[%s5266_s3 + $0x18] sm:$0xff] }
  0x28   :  { %v4337_v57 = vld [vmem:[%s5266_s3 + $0x28] sm:$0xff]  ;;  %v4355_v20 = vld [vmem:[%s5266_s3 + $0x70] sm:$0xff] }
  0x29   :  { %v4346_v63 = vld [vmem:[%s5266_s3 + $0x8] sm:$0xff] }
  0x2a   :  { %3362 = vmatmul.mubr.msk.bf16.gmra.mxu0 %vm523_vm2, %v3669_v21 }
  0x2b   :  { %3365 = vmatprep.mubr.msk.bf16.mxu0 %vm523_vm2, %v3670_v22 }
  0x32   :  { %3366 = vmatmul.mubr.msk.bf16.gmra.mxu0 %vm523_vm2, %v3671_v23 }
  0x33   :  { %3369 = vmatprep.mubr.msk.bf16.mxu0 %vm523_vm2, %v3672_v24 }
  0x3a   :  { %3370 = vmatmul.mubr.msk.bf16.gmra.mxu0 %vm523_vm2, %v3673_v25  ;;  %v4361_v25 = vld [vmem:[%s5266_s3 + $0x60] sm:$0xff] }
  0x3b   :  { %3373 = vmatprep.mubr.msk.bf16.mxu0 %vm523_vm2, %v3674_v26 }
  0x42   :  { %3374 = vmatmul.mubr.msk.bf16.gmra.mxu0 %vm523_vm2, %v3675_v27  ;;  %v4366_v27 = vld [vmem:[%s5266_s3 + $0x78] sm:$0xff] }
  0xc5   :  { %v3477_v28 = vpop.f32.mrf.mxu1 }
  0xc7   :  { %v1380_v29 = vpop.f32.mrf.mxu1 }
  0xc9   :  { %v3478_v30 = vpop.f32.mrf.mxu1 }
  0xca   :  { %v3347_v31 = vpop.f32.mrf.mxu0 }
  0xcb   :  { %v1383_v32 = vpop.f32.mrf.mxu1  ;;  %v1267_v49 = vadd.f32 %v3347_v31, %v4304_v42 }
  0xcc   :  { %v754_v33 = vpop.f32.mrf.mxu0 }
  0xcd   :  { %v3481_v34 = vpop.f32.mrf.mxu1  ;;  %v1265_v59 = vadd.f32 %v754_v33, %v4323_v50  ;;  %v1445_v61 = vadd.f32 %v3477_v28, %v1267_v49  ;;  %v4373_v33 = vld [vmem:[%s5266_s3 + $0x68] sm:$0xff]  ;;  %v4390_v49 = vld [vmem:[%s5266_s3 + $0x40] sm:$0xff] }
  0xce   :  { %v3348_v35 = vpop.f32.mrf.mxu0 }
  0xcf   :  { %v1396_v36 = vpop.f32.mrf.mxu1  ;;  %v1268_v62 = vadd.f32 %v3348_v35, %v4330_v52  ;;  %v1443_v7 = vadd.f32 %v1380_v29, %v1265_v59  ;;  %v4396_v59 = vld [vmem:[%s5266_s3 + $0x48] sm:$0xff] }
  0xd0   :  { %v757_v37 = vpop.f32.mrf.mxu0 }
  0xd1   :  { %v3482_v38 = vpop.f32.mrf.mxu1  ;;  %v1266_v9 = vadd.f32 %v757_v37, %v4346_v63  ;;  %v1446_v13 = vadd.f32 %v3478_v30, %v1268_v62 }
  0xd2   :  { %v3351_v40 = vpop.f32.mrf.mxu0 }
  0xd3   :  { %v1399_v41 = vpop.f32.mrf.mxu1  ;;  %v1271_v44 = vadd.f32 %v3351_v40, %v4299_v39  ;;  %v1444_v21 = vadd.f32 %v1383_v32, %v1266_v9  ;;  %v4383_v40 = vld [vmem:[%s5266_s3 + $0x58] sm:$0xff] }
  0xd4   :  { %v770_v43 = vpop.f32.mrf.mxu0 }
  0xd5   :  { %v4312_v46 = vpop.f32.mrf.mxu1  ;;  %v1269_v53 = vadd.f32 %v770_v43, %v4310_v45  ;;  %v1449_v55 = vadd.f32 %v3481_v34, %v1271_v44 }
  0xd6   :  { %v3352_v48 = vpop.f32.mrf.mxu0 }
  0xd7   :  { %v4325_v51 = vpop.f32.mrf.mxu1  ;;  %v1272_v56 = vadd.f32 %v3352_v48, %v4317_v47  ;;  %v1447_v1 = vadd.f32 %v1396_v36, %v1269_v53  ;;  %3725 = vtanh.f32 %v1449_v55  ;;  %v4378_v36 = vld [vmem:[%s5266_s3 + $0x50] sm:$0xff] }
  0xd8   :  { %v773_v54 = vpop.f32.mrf.mxu0  ;;  %3727 = vtanh.f32 %v1445_v61 }
  0xd9   :  { %v4339_v58 = vpop.f32.mrf.mxu1  ;;  %v1270_v3 = vadd.f32 %v773_v54, %v4337_v57  ;;  %v1450_v6 = vadd.f32 %v3482_v38, %v1272_v56  ;;  %3729 = vtanh.f32 %v1447_v1 }
  0xda   :  { %v3355_v60 = vpop.f32.mrf.mxu0 }
  0xdb   :  { %v4348_v0 = vpop.f32.mrf.mxu1  ;;  %v1448_v17 = vadd.f32 %v1399_v41, %v1270_v3  ;;  %3731 = vtanh.f32 %v1450_v6  ;;  %v1275_v48 = vadd.f32 %v3355_v60, %v4378_v36 }
  0xdc   :  { %v786_v4 = vpop.f32.mrf.mxu0  ;;  %3733 = vtanh.f32 %v1443_v7 }
  0xdd   :  { %v3489_v16 = vpop.f32.mrf.mxu1  ;;  %3735 = vtanh.f32 %v1446_v13  ;;  %v1273_v60 = vadd.f32 %v786_v4, %v4390_v49  ;;  %v1453_v7 = vadd.f32 %v4312_v46, %v1275_v48 }
  0xde   :  { %v3356_v12 = vpop.f32.mrf.mxu0  ;;  %3737 = vtanh.f32 %v1448_v17 }
  0xdf   :  { %v1428_v23 = vpop.f32.mrf.mxu1  ;;  %3739 = vtanh.f32 %v1444_v21  ;;  %v1276_v56 = vadd.f32 %v3356_v12, %v4383_v40 }
  0xe0   :  { %v789_v19 = vpop.f32.mrf.mxu0 }
  0xe1   :  { %v3490_v31 = vpop.f32.mrf.mxu1  ;;  %v1274_v9 = vadd.f32 %v789_v19, %v4396_v59  ;;  %v1454_v17 = vadd.f32 %v4339_v58, %v1276_v56 }
  0xe2   :  { %v3359_v22 = vpop.f32.mrf.mxu0 }
  0xe3   :  { %v1279_v24 = vadd.f32 %v3359_v22, %v4355_v20  ;;  %v1431_v43 = vpop.f32.mrf.mxu1 }
  0xe4   :  { %v802_v26 = vpop.f32.mrf.mxu0  ;;  %v3726_v38 = vpop.eup %3725 }
  0xe5   :  { %v1457_v28 = vadd.f32 %v3489_v16, %v1279_v24  ;;  %v1277_v29 = vadd.f32 %v802_v26, %v4361_v25  ;;  %v3728_v44 = vpop.eup %3727  ;;  %v1485_v55 = vmul.f32 0.5, %v3726_v38  ;;  %v1451_v26 = vadd.f32 %v4325_v51, %v1273_v60 }
  0xe6   :  { %v3360_v30 = vpop.f32.mrf.mxu0  ;;  %v3730_v54 = vpop.eup %3729  ;;  %v1477_v1 = vmul.f32 0.5, %v3728_v44 }
  0xe7   :  { %3741 = vtanh.f32 %v1457_v28  ;;  %v1280_v32 = vadd.f32 %v3360_v30, %v4366_v27  ;;  %v1455_v34 = vadd.f32 %v1428_v23, %v1277_v29  ;;  %v1483_v6 = vmul.f32 0.5, %v3730_v54 }
  0xe8   :  { %v805_v35 = vpop.f32.mrf.mxu0  ;;  %v3732_v61 = vpop.eup %3731  ;;  %v1489_v16 = vadd.f32 0.5, %v1485_v55  ;;  %v1481_v23 = vadd.f32 0.5, %v1477_v1  ;;  %v1452_v30 = vadd.f32 %v4348_v0, %v1274_v9 }
  0xe9   :  { %v1458_v37 = vadd.f32 %v3490_v31, %v1280_v32  ;;  %3743 = vtanh.f32 %v1455_v34  ;;  %v1278_v41 = vadd.f32 %v805_v35, %v4373_v33  ;;  %v3734_v62 = vpop.eup %3733  ;;  %v1486_v12 = vmul.f32 0.5, %v3732_v61 }
  0xea   :  { %v3736_v3 = vpop.eup %3735  ;;  %v1475_v21 = vmul.f32 0.5, %v3734_v62  ;;  %v1487_v29 = vadd.f32 0.5, %v1483_v6  ;;  %v1501_v46 = vmul.f32 0.0, %v1489_v16 }
  0xeb   :  { %3745 = vtanh.f32 %v1458_v37  ;;  %v1456_v53 = vadd.f32 %v1431_v43, %v1278_v41  ;;  %v3738_v13 = vpop.eup %3737  ;;  %v1478_v24 = vmul.f32 0.5, %v3736_v3  ;;  %v1490_v31 = vadd.f32 0.5, %v1486_v12 }
  0xec   :  { %v3740_v22 = vpop.eup %3739  ;;  %v1484_v4 = vmul.f32 0.5, %v3738_v13  ;;  %v1479_v32 = vadd.f32 0.5, %v1475_v21  ;;  %v1499_v41 = vmul.f32 0.0, %v1487_v29 }
  0xed   :  { %3747 = vtanh.f32 %v1456_v53  ;;  %v1476_v34 = vmul.f32 0.5, %v3740_v22  ;;  %v1482_v58 = vadd.f32 0.5, %v1478_v24  ;;  %v1502_v44 = vmul.f32 0.0, %v1490_v31 }
  0xee   :  { %3749 = vtanh.f32 %v1453_v7  ;;  %v1488_v51 = vadd.f32 0.5, %v1484_v4 }
  0xef   :  { %3751 = vtanh.f32 %v1454_v17  ;;  %v1480_v53 = vadd.f32 0.5, %v1476_v34  ;;  %v3681_v34 = vld [vmem:[%s5264_s1 + $0xa8] sm:$0xff]  }
  0xf0   :  { %3753 = vtanh.f32 %v1451_v26  ;;  %v1500_v56 = vmul.f32 0.0, %v1488_v51 }
  0xf1   :  { %3755 = vtanh.f32 %v1452_v30 }
  0xf4   :  { %v3742_v28 = vpop.eup %3741 }
  0xf5   :  { %v1505_v19 = vmul.f32 %v3742_v28, %v1481_v23 }
  0xf6   :  { %v3744_v35 = vpop.eup %3743 }
  0xf7   :  { %v4404_v37 = vadd.f32 %v1505_v19, %v1501_v46  ;;  %v1503_v43 = vmul.f32 %v3744_v35, %v1479_v32  ;;  %v3680_v32 = vld [vmem:[%s5264_s1 + $0xa0] sm:$0xff]   ;;  %v3682_v35 = vld [vmem:[%s5264_s1 + $0xb0] sm:$0xff]  }
  0xf8   :  { %v3746_v38 = vpop.eup %3745 }
  0xf9   :  { %v1506_v48 = vmul.f32 %v3746_v38, %v1482_v58  ;;  %v4406_v0 = vadd.f32 %v1503_v43, %v1499_v41  ;;  %3757 = vtanh.f32 %v4404_v37  ;;  %v3683_v58 = vld [vmem:[%s5264_s1 + $0xb8] sm:$0xff]   ;;  %v3363_v38 = vpop.f32.mrf.mxu0 }
  0xfa   :  { %v3748_v54 = vpop.eup %3747 }
  0xfb   :  { %v4408_v55 = vadd.f32 %v1506_v48, %v1502_v44  ;;  %v1504_v61 = vmul.f32 %v3748_v54, %v1480_v53  ;;  %v3750_v1 = vpop.eup %3749  ;;  %v818_v41 = vpop.f32.mrf.mxu0 }
  0xfc   :  { %v3752_v60 = vpop.eup %3751  ;;  %v1493_v7 = vmul.f32 0.5, %v3750_v1 }
  0xfd   :  { %3759 = vtanh.f32 %v4408_v55  ;;  %v4412_v62 = vadd.f32 %v1504_v61, %v1500_v56  ;;  %v3754_v3 = vpop.eup %3753  ;;  %v1494_v9 = vmul.f32 0.5, %v3752_v60  ;;  %v3364_v51 = vpop.f32.mrf.mxu0 }
  0xfe   :  { %3761 = vtanh.f32 %v4406_v0  ;;  %v3756_v6 = vpop.eup %3755  ;;  %v1491_v16 = vmul.f32 0.5, %v3754_v3  ;;  %v1497_v17 = vadd.f32 0.5, %v1493_v7 }
  0xff   :  { %3763 = vtanh.f32 %v4412_v62  ;;  %v1492_v12 = vmul.f32 0.5, %v3756_v6  ;;  %v1498_v21 = vadd.f32 0.5, %v1494_v9  ;;  %v821_v43 = vpop.f32.mrf.mxu0 }
 0x100   :  { %v1495_v28 = vadd.f32 0.5, %v1491_v16 }
 0x101   :  { %v1496_v29 = vadd.f32 0.5, %v1492_v12  ;;  %v3367_v44 = vpop.f32.mrf.mxu0 }
 0x102   :  { %v1525_v16 = vadd.f32 %v3367_v44, %v4299_v39 }
 0x103   :  { %v834_v48 = vpop.f32.mrf.mxu0 }
 0x105   :  { %v3368_v53 = vpop.f32.mrf.mxu0 }
 0x106   :  { %v3758_v13 = vpop.eup %3757 }
 0x107   :  { %v1517_v24 = vmul.f32 %v3758_v13, %v1497_v17  ;;  %v837_v54 = vpop.f32.mrf.mxu0  ;;  %v1521_v13 = vadd.f32 %v3363_v38, %v4304_v42 }
 0x109   :  { %v3371_v56 = vpop.f32.mrf.mxu0 }
 0x10a   :  { %v3760_v22 = vpop.eup %3759 }
 0x10b   :  { %v3762_v23 = vpop.eup %3761  ;;  %v1518_v26 = vmul.f32 %v3760_v22, %v1498_v21  ;;  %v4464_v60 = vpop.f32.mrf.mxu0 }
 0x10c   :  { %v3764_v4 = vpop.eup %3763  ;;  %v1515_v46 = vmul.f32 %v3762_v23, %v1495_v28  ;;  %v1523_v23 = vadd.f32 %v834_v48, %v4310_v45 }
 0x10d   :  { %v1536_v30 = vpack.c.bf16 %v1518_v26, %v1517_v24  ;;  %v1516_v31 = vmul.f32 %v3764_v4, %v1496_v29  ;;  %v4466_v7 = vpop.f32.mrf.mxu0  ;;  %v1519_v29 = vadd.f32 %v818_v41, %v4323_v50 }
 0x10f   :  { %3491 = vmatprep.subr.bf16.mxu1 %v1536_v30  ;;  %v1535_v19 = vpack.c.bf16 %v1516_v31, %v1515_v46  ;;  %v4470_v17 = vpop.f32.mrf.mxu0 }
 0x110   :  { %3492 = vmatpush3.bf16.msra.mxu1 %v1536_v30  ;;  %v1526_v30 = vadd.f32 %v3368_v53, %v4317_v47 }
 0x111   :  { %3493 = vmatprep.subr.bf16.mxu1 %v1535_v19  ;;  %v3375_v28 = vpop.f32.mrf.mxu0 }
 0x112   :  { %v1533_v41 = vadd.f32 %v3375_v28, %v4355_v20 }
 0x114   :  { %3494 = vmatpush3.bf16.msra.mxu1 %v1535_v19  ;;  %v1524_v19 = vadd.f32 %v837_v54, %v4337_v57 }
 0x117   :  { %3496 = vmatmul.mubr.msk.bf16.vlgmr.msra.gmra.mxu1 %vm1321_vm1, %v4184_v5  ;;  %v3676_v5 = vld [vmem:[%s5264_s1 + $0x80] sm:$0xff]  }
 0x118   :  { %3499 = vmatprep.mubr.msk.bf16.mxu1 %vm1321_vm1, %v4198_v8  ;;  %v3677_v8 = vld [vmem:[%s5264_s1 + $0x88] sm:$0xff]   ;;  %3377 = vmatprep.mubr.msk.bf16.mxu0 %vm523_vm2, %v3676_v5  ;;  %v1522_v5 = vadd.f32 %v3364_v51, %v4330_v52 }
 0x119   :  { %3378 = vmatmul.mubr.msk.bf16.gmra.mxu0 %vm523_vm2, %v3677_v8 }
 0x11f   :  { %3500 = vmatmul.mubr.msk.bf16.gmra.mxu1 %vm1321_vm1, %v4208_v10  ;;  %v3678_v10 = vld [vmem:[%s5264_s1 + $0x90] sm:$0xff]  }
 0x120   :  { %3503 = vmatprep.mubr.msk.bf16.mxu1 %vm1321_vm1, %v4214_v11  ;;  %3381 = vmatprep.mubr.msk.bf16.mxu0 %vm523_vm2, %v3678_v10  ;;  %v866_v10 = vpop.f32.mrf.mxu0 }
 0x121   :  { %v1531_v53 = vadd.f32 %v866_v10, %v4361_v25 }
 0x122   :  { %v3376_v44 = vpop.f32.mrf.mxu0 }
 0x127   :  { %3504 = vmatmul.mubr.msk.bf16.gmra.mxu1 %vm1321_vm1, %v4230_v14 }
 0x128   :  { %3507 = vmatprep.mubr.msk.bf16.mxu1 %vm1321_vm1, %v4235_v15 }
 0x12f   :  { %3508 = vmatmul.mubr.msk.bf16.gmra.mxu1 %vm1321_vm1, %v4252_v18 }
 0x130   :  { %3515 = vmatprep.mubr.msk.bf16.mxu1 %vm1321_vm1, %v4174_v2  ;;  %v3679_v2 = vld [vmem:[%s5264_s1 + $0x98] sm:$0xff]  }
 0x131   :  { %3382 = vmatmul.mubr.msk.bf16.gmra.mxu0 %vm523_vm2, %v3679_v2 }
 0x132   :  { %3385 = vmatprep.mubr.msk.bf16.mxu0 %vm523_vm2, %v3680_v32  ;;  %v1520_v32 = vadd.f32 %v821_v43, %v4346_v63 }
 0x139   :  { %3386 = vmatmul.mubr.msk.bf16.gmra.mxu0 %vm523_vm2, %v3681_v34 }
 0x13a   :  { %3389 = vmatprep.mubr.msk.bf16.mxu0 %vm523_vm2, %v3682_v35 }
 0x141   :  { %3390 = vmatmul.mubr.msk.bf16.gmra.mxu0 %vm523_vm2, %v3683_v58 }
 0x1d7   :  { %v3497_v61 = vpop.f32.mrf.mxu1 }
 0x1d8   :  { %v1636_v22 = vadd.f32 %v3497_v61, %v1521_v13  ;;  %v869_v61 = vpop.f32.mrf.mxu0 }
 0x1d9   :  { %v1571_v1 = vpop.f32.mrf.mxu1 }
 0x1da   :  { %3765 = vtanh.f32 %v1636_v22  ;;  %v1634_v31 = vadd.f32 %v1571_v1, %v1519_v29 }
 0x1db   :  { %v3498_v3 = vpop.f32.mrf.mxu1 }
 0x1dc   :  { %v1637_v35 = vadd.f32 %v3498_v3, %v1522_v5  ;;  %v1534_v3 = vadd.f32 %v3376_v44, %v4366_v27  ;;  %v1530_v5 = vadd.f32 %v4466_v7, %v4383_v40 }
 0x1dd   :  { %v1574_v6 = vpop.f32.mrf.mxu1 }
 0x1de   :  { %v1635_v38 = vadd.f32 %v1574_v6, %v1520_v32  ;;  %v1532_v6 = vadd.f32 %v869_v61, %v4373_v33 }
 0x1df   :  { %v3501_v9 = vpop.f32.mrf.mxu1 }
 0x1e0   :  { %v1640_v24 = vadd.f32 %v3501_v9, %v1525_v16 }
 0x1e1   :  { %v1587_v12 = vpop.f32.mrf.mxu1 }
 0x1e2   :  { %v1638_v4 = vadd.f32 %v1587_v12, %v1523_v23  ;;  %3767 = vtanh.f32 %v1640_v24  ;;  %v1529_v24 = vadd.f32 %v3371_v56, %v4378_v36  ;;  %v1528_v56 = vadd.f32 %v4470_v17, %v4396_v59 }
 0x1e3   :  { %v3502_v21 = vpop.f32.mrf.mxu1 }
 0x1e4   :  { %v1641_v8 = vadd.f32 %v3502_v21, %v1526_v30  ;;  %3769 = vtanh.f32 %v1638_v4  ;;  %v1527_v30 = vadd.f32 %v4464_v60, %v4390_v49 }
 0x1e5   :  { %v1590_v26 = vpop.f32.mrf.mxu1  ;;  %3771 = vtanh.f32 %v1634_v31 }
 0x1e6   :  { %v1639_v34 = vadd.f32 %v1590_v26, %v1524_v19  ;;  %3773 = vtanh.f32 %v1641_v8 }
 0x1e7   :  { %v3505_v46 = vpop.f32.mrf.mxu1  ;;  %v3766_v13 = vpop.eup %3765 }
 0x1e8   :  { %3775 = vtanh.f32 %v1639_v34  ;;  %v1668_v4 = vmul.f32 0.5, %v3766_v13  ;;  %v1644_v8 = vadd.f32 %v3505_v46, %v1529_v24 }
 0x1e9   :  { %v1603_v2 = vpop.f32.mrf.mxu1  ;;  %3777 = vtanh.f32 %v1637_v35 }
 0x1ea   :  { %3779 = vtanh.f32 %v1635_v38  ;;  %v1642_v34 = vadd.f32 %v1603_v2, %v1527_v30 }
 0x1eb   :  { %v3506_v58 = vpop.f32.mrf.mxu1 }
 0x1ec   :  { %v1645_v44 = vadd.f32 %v3506_v58, %v1530_v5 }
 0x1ed   :  { %v1606_v48 = vpop.f32.mrf.mxu1 }
 0x1ee   :  { %v1643_v60 = vadd.f32 %v1606_v48, %v1528_v56 }
 0x1ef   :  { %v3509_v51 = vpop.f32.mrf.mxu1  ;;  %v3768_v21 = vpop.eup %3767 }
 0x1f0   :  { %v1648_v54 = vadd.f32 %v3509_v51, %v1533_v41  ;;  %v1676_v28 = vmul.f32 0.5, %v3768_v21  ;;  %v1672_v51 = vadd.f32 0.5, %v1668_v4 }
 0x1f1   :  { %v1619_v43 = vpop.f32.mrf.mxu1  ;;  %v3770_v23 = vpop.eup %3769 }
 0x1f2   :  { %3781 = vtanh.f32 %v1648_v54  ;;  %v1646_v1 = vadd.f32 %v1619_v43, %v1531_v53  ;;  %v3772_v26 = vpop.eup %3771  ;;  %v1674_v31 = vmul.f32 0.5, %v3770_v23  ;;  %v1680_v38 = vadd.f32 0.5, %v1676_v28 }
 0x1f3   :  { %v3510_v9 = vpop.f32.mrf.mxu1  ;;  %v3774_v29 = vpop.eup %3773  ;;  %v1666_v32 = vmul.f32 0.5, %v3772_v26 }
 0x1f4   :  { %3783 = vtanh.f32 %v1646_v1  ;;  %v1649_v16 = vadd.f32 %v3510_v9, %v1534_v3  ;;  %v1677_v41 = vmul.f32 0.5, %v3774_v29  ;;  %v1678_v53 = vadd.f32 0.5, %v1674_v31 }
 0x1f5   :  { %v1622_v12 = vpop.f32.mrf.mxu1  ;;  %v3776_v19 = vpop.eup %3775  ;;  %v1670_v1 = vadd.f32 0.5, %v1666_v32  ;;  %v1692_v9 = vmul.f32 %v1680_v38, %v4404_v37 }
 0x1f6   :  { %v1647_v22 = vadd.f32 %v1622_v12, %v1532_v6  ;;  %3785 = vtanh.f32 %v1649_v16  ;;  %v3778_v10 = vpop.eup %3777  ;;  %v1675_v54 = vmul.f32 0.5, %v3776_v19  ;;  %v1681_v17 = vadd.f32 0.5, %v1677_v41 }
 0x1f7   :  { %v3780_v35 = vpop.eup %3779  ;;  %v1669_v43 = vmul.f32 0.5, %v3778_v10  ;;  %v1690_v2 = vmul.f32 %v1678_v53, %v4406_v0 }
 0x1f8   :  { %3787 = vtanh.f32 %v1647_v22  ;;  %v1667_v7 = vmul.f32 0.5, %v3780_v35  ;;  %v1679_v6 = vadd.f32 0.5, %v1675_v54  ;;  %v1693_v23 = vmul.f32 %v1681_v17, %v4408_v55  ;;  %v3690_v17 = vld [vmem:[%s5264_s1 + $0xf0] sm:$0xff]  }
 0x1f9   :  { %3789 = vtanh.f32 %v1644_v8  ;;  %v1673_v13 = vadd.f32 0.5, %v1669_v43  ;;  %v4508_v43 = vld [vmem:[%s5265_s2 + $0x8] sm:$0xff]  }
 0x1fa   :  { %3791 = vtanh.f32 %v1642_v34  ;;  %v1671_v12 = vadd.f32 0.5, %v1667_v7  ;;  %v1691_v37 = vmul.f32 %v1679_v6, %v4412_v62  ;;  %v4522_v7 = vld [vmem:[%s5265_s2 + $0x18] sm:$0xff]   ;;  %v3379_v6 = vpop.f32.mrf.mxu0 }
 0x1fb   :  { %3793 = vtanh.f32 %v1645_v44 }
 0x1fc   :  { %3795 = vtanh.f32 %v1643_v60 }
 0x1ff   :  { %v3782_v61 = vpop.eup %3781 }
 0x200   :  { %v1696_v46 = vmul.f32 %v3782_v61, %v1672_v51 }
 0x201   :  { %v3784_v3 = vpop.eup %3783 }
 0x202   :  { %v1694_v58 = vmul.f32 %v3784_v3, %v1670_v1  ;;  %v4491_v16 = vadd.f32 %v1696_v46, %v1692_v9  ;;  %v4515_v1 = vld [vmem:[%s5265_s2 + $0x10] sm:$0xff]   ;;  %v4537_v46 = vld [vmem:[%s5265_s2] sm:$0xff]   ;;  %v3689_v9 = vld [vmem:[%s5264_s1 + $0xe8] sm:$0xff]  }
 0x203   :  { %v3786_v48 = vpop.eup %3785  ;;  %v3688_v3 = vld [vmem:[%s5264_s1 + $0xe0] sm:$0xff]  }
 0x204   :  { %v4493_v21 = vadd.f32 %v1694_v58, %v1690_v2  ;;  %v1697_v24 = vmul.f32 %v3786_v48, %v1673_v13  ;;  %3797 = vtanh.f32 %v4491_v16  ;;  %v3691_v2 = vld [vmem:[%s5264_s1 + $0xf8] sm:$0xff]   ;;  %v882_v58 = vpop.f32.mrf.mxu0 }
 0x205   :  { %v3788_v22 = vpop.eup %3787 }
 0x206   :  { %v1695_v26 = vmul.f32 %v3788_v22, %v1671_v12  ;;  %v4498_v0 = vadd.f32 %v1697_v24, %v1693_v23  ;;  %3799 = vtanh.f32 %v4493_v21  ;;  %v3790_v29 = vpop.eup %3789  ;;  %v3380_v13 = vpop.f32.mrf.mxu0 }
 0x207   :  { %v3792_v4 = vpop.eup %3791  ;;  %v1684_v31 = vmul.f32 0.5, %v3790_v29 }
 0x208   :  { %v4501_v28 = vadd.f32 %v1695_v26, %v1691_v37  ;;  %3801 = vtanh.f32 %v4498_v0  ;;  %v3794_v30 = vpop.eup %3793  ;;  %v1682_v62 = vmul.f32 0.5, %v3792_v4  ;;  %v885_v48 = vpop.f32.mrf.mxu0 }
 0x209   :  { %v3796_v55 = vpop.eup %3795  ;;  %v1685_v19 = vmul.f32 0.5, %v3794_v30  ;;  %v1688_v32 = vadd.f32 0.5, %v1684_v31 }
 0x20a   :  { %3803 = vtanh.f32 %v4501_v28  ;;  %v1683_v5 = vmul.f32 0.5, %v3796_v55  ;;  %v1686_v35 = vadd.f32 0.5, %v1682_v62  ;;  %v3383_v12 = vpop.f32.mrf.mxu0  ;;  %v1712_v62 = vadd.f32 %v3379_v6, %v4304_v42 }
 0x20b   :  { %v1689_v56 = vadd.f32 0.5, %v1685_v19 }
 0x20c   :  { %v1687_v38 = vadd.f32 0.5, %v1683_v5  ;;  %v898_v22 = vpop.f32.mrf.mxu0  ;;  %v1716_v5 = vadd.f32 %v3383_v12, %v4299_v39 }
 0x20e   :  { %v3384_v23 = vpop.f32.mrf.mxu0 }
 0x210   :  { %v901_v24 = vpop.f32.mrf.mxu0 }
 0x211   :  { %v3798_v8 = vpop.eup %3797  ;;  %v1715_v39 = vadd.f32 %v901_v24, %v4337_v57 }
 0x212   :  { %v1708_v44 = vmul.f32 %v3798_v8, %v1688_v32  ;;  %v3387_v37 = vpop.f32.mrf.mxu0 }
 0x213   :  { %v3800_v10 = vpop.eup %3799 }
 0x214   :  { %v1706_v53 = vmul.f32 %v3800_v10, %v1686_v35  ;;  %v4573_v4 = vpop.f32.mrf.mxu0 }
 0x215   :  { %v3802_v34 = vpop.eup %3801 }
 0x216   :  { %v1709_v51 = vmul.f32 %v3802_v34, %v1689_v56  ;;  %v4575_v31 = vpop.f32.mrf.mxu0  ;;  %v1714_v34 = vadd.f32 %v898_v22, %v4310_v45  ;;  %v1711_v45 = vadd.f32 %v885_v48, %v4346_v63 }
 0x217   :  { %v3804_v41 = vpop.eup %3803 }
 0x218   :  { %v1707_v54 = vmul.f32 %v3804_v41, %v1687_v38  ;;  %v1727_v60 = vpack.c.bf16 %v1709_v51, %v1708_v44  ;;  %v4579_v10 = vpop.f32.mrf.mxu0  ;;  %v1710_v44 = vadd.f32 %v882_v58, %v4323_v50 }
 0x21a   :  { %v1726_v61 = vpack.c.bf16 %v1707_v54, %v1706_v53  ;;  %3511 = vmatprep.subr.bf16.mxu1 %v1727_v60  ;;  %v3391_v41 = vpop.f32.mrf.mxu0  ;;  %v1717_v53 = vadd.f32 %v3384_v23, %v4317_v47 }
 0x21b   :  { %3512 = vmatpush3.bf16.msra.mxu1 %v1727_v60  ;;  %v1713_v60 = vadd.f32 %v3380_v13, %v4330_v52  ;;  %v1724_v47 = vadd.f32 %v3391_v41, %v4355_v20 }
 0x21c   :  { %3513 = vmatprep.subr.bf16.mxu1 %v1726_v61 }
 0x21f   :  { %3514 = vmatpush3.bf16.msra.mxu1 %v1726_v61 }
 0x222   :  { %3516 = vmatmul.mubr.msk.bf16.vlgmr.msra.gmra.mxu1 %vm1321_vm1, %v4508_v43 }
 0x223   :  { %3519 = vmatprep.mubr.msk.bf16.mxu1 %vm1321_vm1, %v4515_v1 }
 0x22a   :  { %3520 = vmatmul.mubr.msk.bf16.gmra.mxu1 %vm1321_vm1, %v4522_v7 }
 0x22b   :  { %3523 = vmatprep.mubr.msk.bf16.mxu1 %vm1321_vm1, %v4214_v11  ;;  %v3684_v11 = vld [vmem:[%s5264_s1 + $0xc0] sm:$0xff]  }
 0x22c   :  { %3393 = vmatprep.mubr.msk.bf16.mxu0 %vm523_vm2, %v3684_v11  ;;  %v930_v11 = vpop.f32.mrf.mxu0 }
 0x22d   :  { %v1722_v57 = vadd.f32 %v930_v11, %v4361_v25 }
 0x232   :  { %3524 = vmatmul.mubr.msk.bf16.gmra.mxu1 %vm1321_vm1, %v4230_v14  ;;  %v3685_v14 = vld [vmem:[%s5264_s1 + $0xc8] sm:$0xff]  }
 0x233   :  { %3527 = vmatprep.mubr.msk.bf16.mxu1 %vm1321_vm1, %v4235_v15  ;;  %3394 = vmatmul.mubr.msk.bf16.gmra.mxu0 %vm523_vm2, %v3685_v14  ;;  %v3686_v15 = vld [vmem:[%s5264_s1 + $0xd0] sm:$0xff]  }
 0x234   :  { %3397 = vmatprep.mubr.msk.bf16.mxu0 %vm523_vm2, %v3686_v15 }
 0x23a   :  { %3528 = vmatmul.mubr.msk.bf16.gmra.mxu1 %vm1321_vm1, %v4252_v18  ;;  %v3687_v18 = vld [vmem:[%s5264_s1 + $0xd8] sm:$0xff]  }
 0x23b   :  { %3535 = vmatprep.mubr.msk.bf16.mxu1 %vm1321_vm1, %v4537_v46  ;;  %3398 = vmatmul.mubr.msk.bf16.gmra.mxu0 %vm523_vm2, %v3687_v18 }
 0x23c   :  { %3401 = vmatprep.mubr.msk.bf16.mxu0 %vm523_vm2, %v3688_v3 }
 0x243   :  { %3402 = vmatmul.mubr.msk.bf16.gmra.mxu0 %vm523_vm2, %v3689_v9  ;;  %v3392_v9 = vpop.f32.mrf.mxu0 }
 0x244   :  { %3405 = vmatprep.mubr.msk.bf16.mxu0 %vm523_vm2, %v3690_v17  ;;  %v1725_v13 = vadd.f32 %v3392_v9, %v4366_v27  ;;  %v1718_v27 = vadd.f32 %v4573_v4, %v4390_v49 }
 0x245   :  { %v933_v6 = vpop.f32.mrf.mxu0 }
 0x246   :  { %v1723_v12 = vadd.f32 %v933_v6, %v4373_v33 }
 0x24b   :  { %3406 = vmatmul.mubr.msk.bf16.gmra.mxu0 %vm523_vm2, %v3691_v2 }
 0x2e2   :  { %v3517_v26 = vpop.f32.mrf.mxu1 }
 0x2e3   :  { %v1827_v56 = vadd.f32 %v3517_v26, %v1712_v62 }
 0x2e4   :  { %v1762_v29 = vpop.f32.mrf.mxu1 }
 0x2e5   :  { %3805 = vtanh.f32 %v1827_v56  ;;  %v1825_v42 = vadd.f32 %v1762_v29, %v1710_v44 }
 0x2e6   :  { %v3518_v30 = vpop.f32.mrf.mxu1 }
 0x2e7   :  { %v1828_v18 = vadd.f32 %v3518_v30, %v1713_v60  ;;  %v1720_v30 = vadd.f32 %v3387_v37, %v4378_v36  ;;  %v1719_v36 = vadd.f32 %v4579_v10, %v4396_v59 }
 0x2e8   :  { %v1765_v55 = vpop.f32.mrf.mxu1 }
 0x2e9   :  { %v1826_v3 = vadd.f32 %v1765_v55, %v1711_v45 }
 0x2ea   :  { %v3521_v19 = vpop.f32.mrf.mxu1 }
 0x2eb   :  { %v1831_v35 = vadd.f32 %v3521_v19, %v1716_v5 }
 0x2ec   :  { %v1778_v8 = vpop.f32.mrf.mxu1 }
 0x2ed   :  { %v1829_v51 = vadd.f32 %v1778_v8, %v1714_v34  ;;  %3807 = vtanh.f32 %v1831_v35  ;;  %v1721_v8 = vadd.f32 %v4575_v31, %v4383_v40 }
 0x2ee   :  { %v3522_v32 = vpop.f32.mrf.mxu1 }
 0x2ef   :  { %v1832_v61 = vadd.f32 %v3522_v32, %v1717_v53  ;;  %3809 = vtanh.f32 %v1829_v51 }
 0x2f0   :  { %v1781_v38 = vpop.f32.mrf.mxu1  ;;  %3811 = vtanh.f32 %v1825_v42 }
 0x2f1   :  { %v1830_v15 = vadd.f32 %v1781_v38, %v1715_v39  ;;  %3813 = vtanh.f32 %v1832_v61 }
 0x2f2   :  { %v3525_v54 = vpop.f32.mrf.mxu1  ;;  %v3806_v20 = vpop.eup %3805 }
 0x2f3   :  { %3815 = vtanh.f32 %v1830_v15  ;;  %v1859_v62 = vmul.f32 0.5, %v3806_v20  ;;  %v1835_v32 = vadd.f32 %v3525_v54, %v1720_v30 }
 0x2f4   :  { %v1794_v14 = vpop.f32.mrf.mxu1  ;;  %3817 = vtanh.f32 %v1828_v18 }
 0x2f5   :  { %3819 = vtanh.f32 %v1826_v3  ;;  %v1833_v37 = vadd.f32 %v1794_v14, %v1718_v27  ;;  %v1863_v51 = vadd.f32 0.5, %v1859_v62 }
 0x2f6   :  { %v3526_v50 = vpop.f32.mrf.mxu1 }
 0x2f7   :  { %v1836_v44 = vadd.f32 %v3526_v50, %v1721_v8  ;;  %v4630_v8 = vld [vmem:[%s5265_s2 + $0x28] sm:$0xff]  }
 0x2f8   :  { %v1797_v17 = vpop.f32.mrf.mxu1 }
 0x2f9   :  { %v1834_v49 = vadd.f32 %v1797_v17, %v1719_v36  ;;  %v3693_v36 = vld [vmem:[%s5264_s1 + $0x108] sm:$0xff]  }
 0x2fa   :  { %v3529_v52 = vpop.f32.mrf.mxu1  ;;  %v3808_v24 = vpop.eup %3807 }
 0x2fb   :  { %v1839_v2 = vadd.f32 %v3529_v52, %v1724_v47  ;;  %v1867_v55 = vmul.f32 0.5, %v3808_v24 }
 0x2fc   :  { %v1810_v63 = vpop.f32.mrf.mxu1  ;;  %v3810_v29 = vpop.eup %3809 }
 0x2fd   :  { %3821 = vtanh.f32 %v1839_v2  ;;  %v1837_v58 = vadd.f32 %v1810_v63, %v1722_v57  ;;  %v3812_v25 = vpop.eup %3811  ;;  %v1865_v5 = vmul.f32 0.5, %v3810_v29  ;;  %v1871_v38 = vadd.f32 0.5, %v1867_v55 }
 0x2fe   :  { %v3530_v48 = vpop.f32.mrf.mxu1  ;;  %v3814_v19 = vpop.eup %3813  ;;  %v1857_v34 = vmul.f32 0.5, %v3812_v25 }
 0x2ff   :  { %3823 = vtanh.f32 %v1837_v58  ;;  %v1840_v22 = vadd.f32 %v3530_v48, %v1725_v13  ;;  %v1868_v41 = vmul.f32 0.5, %v3814_v19  ;;  %v1869_v53 = vadd.f32 0.5, %v1865_v5 }
 0x300   :  { %v1813_v23 = vpop.f32.mrf.mxu1  ;;  %v3816_v33 = vpop.eup %3815  ;;  %v1861_v60 = vadd.f32 0.5, %v1857_v34  ;;  %v1883_v61 = vmul.f32 %v1871_v38, %v4491_v16  ;;  %v3692_v34 = vld [vmem:[%s5264_s1 + $0x100] sm:$0xff]  }
 0x301   :  { %v1838_v26 = vadd.f32 %v1813_v23, %v1723_v12  ;;  %3825 = vtanh.f32 %v1840_v22  ;;  %v3818_v56 = vpop.eup %3817  ;;  %v1866_v42 = vmul.f32 0.5, %v3816_v33  ;;  %v1872_v59 = vadd.f32 0.5, %v1868_v41  ;;  %v4623_v33 = vld [vmem:[%s5265_s2 + $0x20] sm:$0xff]   ;;  %3409 = vmatprep.mubr.msk.bf16.mxu0 %vm523_vm2, %v3692_v34  ;;  %v3697_v41 = vld [vmem:[%s5264_s1 + $0x128] sm:$0xff]  }
 0x302   :  { %v3820_v35 = vpop.eup %3819  ;;  %v1860_v39 = vmul.f32 0.5, %v3818_v56  ;;  %v1881_v10 = vmul.f32 %v1869_v53, %v4493_v21  ;;  %v4644_v56 = vld [vmem:[%s5265_s2 + $0x38] sm:$0xff]   ;;  %3410 = vmatmul.mubr.msk.bf16.gmra.mxu0 %vm523_vm2, %v3693_v36  ;;  %v3696_v38 = vld [vmem:[%s5264_s1 + $0x120] sm:$0xff]   ;;  %v3395_v53 = vpop.f32.mrf.mxu0 }
 0x303   :  { %3827 = vtanh.f32 %v1838_v26  ;;  %v1858_v40 = vmul.f32 0.5, %v3820_v35  ;;  %v1870_v11 = vadd.f32 0.5, %v1866_v42  ;;  %v1884_v9 = vmul.f32 %v1872_v59, %v4498_v0  ;;  %v3695_v35 = vld [vmem:[%s5264_s1 + $0x118] sm:$0xff]  }
 0x304   :  { %3829 = vtanh.f32 %v1835_v32  ;;  %v1864_v45 = vadd.f32 0.5, %v1860_v39  ;;  %v4637_v32 = vld [vmem:[%s5265_s2 + $0x30] sm:$0xff]   ;;  %v946_v42 = vpop.f32.mrf.mxu0 }
 0x305   :  { %3831 = vtanh.f32 %v1833_v37  ;;  %v1862_v50 = vadd.f32 0.5, %v1858_v40  ;;  %v1882_v16 = vmul.f32 %v1870_v11, %v4501_v28  ;;  %v3694_v37 = vld [vmem:[%s5264_s1 + $0x110] sm:$0xff]  }
 0x306   :  { %3833 = vtanh.f32 %v1836_v44  ;;  %3413 = vmatprep.mubr.msk.bf16.mxu0 %vm523_vm2, %v3694_v37  ;;  %v3698_v44 = vld [vmem:[%s5264_s1 + $0x130] sm:$0xff]  }
 0x307   :  { %3835 = vtanh.f32 %v1834_v49  ;;  %v3396_v49 = vpop.f32.mrf.mxu0 }
 0x30a   :  { %v3822_v4 = vpop.eup %3821  ;;  %3414 = vmatmul.mubr.msk.bf16.gmra.mxu0 %vm523_vm2, %v3695_v35 }
 0x30b   :  { %v1887_v31 = vmul.f32 %v3822_v4, %v1863_v51  ;;  %3417 = vmatprep.mubr.msk.bf16.mxu0 %vm523_vm2, %v3696_v38  ;;  %v3699_v51 = vld [vmem:[%s5264_s1 + $0x138] sm:$0xff]   ;;  %v949_v4 = vpop.f32.mrf.mxu0 }
 0x30c   :  { %v3824_v54 = vpop.eup %3823 }
 0x30d   :  { %v1885_v14 = vmul.f32 %v3824_v54, %v1861_v60  ;;  %v4600_v15 = vadd.f32 %v1887_v31, %v1883_v61  ;;  %v3399_v39 = vpop.f32.mrf.mxu0 }
 0x30e   :  { %v3826_v18 = vpop.eup %3825 }
 0x30f   :  { %v4602_v3 = vadd.f32 %v1885_v14, %v1881_v10  ;;  %v1888_v17 = vmul.f32 %v3826_v18, %v1864_v45  ;;  %3837 = vtanh.f32 %v4600_v15  ;;  %v962_v60 = vpop.f32.mrf.mxu0 }
 0x310   :  { %v3828_v47 = vpop.eup %3827 }
 0x311   :  { %v1886_v52 = vmul.f32 %v3828_v47, %v1862_v50  ;;  %v4607_v21 = vadd.f32 %v1888_v17, %v1884_v9  ;;  %3839 = vtanh.f32 %v4602_v3  ;;  %v3830_v2 = vpop.eup %3829  ;;  %v3400_v40 = vpop.f32.mrf.mxu0  ;;  %v4691_v50 = vld [vmem:[%s5266_s3 + $0x10] sm:$0xff] }
 0x312   :  { %v3832_v6 = vpop.eup %3831  ;;  %v1875_v58 = vmul.f32 0.5, %v3830_v2  ;;  %3418 = vmatmul.mubr.msk.bf16.gmra.mxu0 %vm523_vm2, %v3697_v41  ;;  %v1903_v47 = vadd.f32 %v4691_v50, %v3395_v53  ;;  %v4697_v9 = vld [vmem:[%s5266_s3 + $0x30] sm:$0xff] }
 0x313   :  { %v4610_v57 = vadd.f32 %v1886_v52, %v1882_v16  ;;  %3841 = vtanh.f32 %v4607_v21  ;;  %v3834_v63 = vpop.eup %3833  ;;  %v1873_v28 = vmul.f32 0.5, %v3832_v6  ;;  %3421 = vmatprep.mubr.msk.bf16.mxu0 %vm523_vm2, %v3698_v44  ;;  %v965_v31 = vpop.f32.mrf.mxu0  ;;  %v1907_v17 = vadd.f32 %v4697_v9, %v3399_v39  ;;  %v4741_v41 = vld [vmem:[%s5266_s3 + $0x70] sm:$0xff] }
 0x314   :  { %v3836_v0 = vpop.eup %3835  ;;  %v1876_v13 = vmul.f32 0.5, %v3834_v63  ;;  %v1879_v22 = vadd.f32 0.5, %v1875_v58  ;;  %v4705_v63 = vld [vmem:[%s5266_s3 + $0x20] sm:$0xff] }
 0x315   :  { %3843 = vtanh.f32 %v4610_v57  ;;  %v1874_v48 = vmul.f32 0.5, %v3836_v0  ;;  %v1877_v26 = vadd.f32 0.5, %v1873_v28  ;;  %v4682_v54 = vpop.f32.mrf.mxu0  ;;  %v1905_v0 = vadd.f32 %v4705_v63, %v962_v60 }
 0x316   :  { %v1880_v23 = vadd.f32 0.5, %v1876_v13 }
 0x317   :  { %v1878_v29 = vadd.f32 0.5, %v1874_v48  ;;  %v4684_v10 = vpop.f32.mrf.mxu0  ;;  %v4711_v48 = vld [vmem:[%s5266_s3] sm:$0xff] }
 0x319   :  { %v4686_v45 = vpop.f32.mrf.mxu0 }
 0x31a   :  { %3422 = vmatmul.mubr.msk.bf16.gmra.mxu0 %vm523_vm2, %v3699_v51 }
 0x31b   :  { %v4700_v52 = vpop.f32.mrf.mxu0 }
 0x31c   :  { %v3838_v12 = vpop.eup %3837 }
 0x31d   :  { %v1899_v25 = vmul.f32 %v3838_v12, %v1879_v22  ;;  %v3407_v28 = vpop.f32.mrf.mxu0  ;;  %v1901_v12 = vadd.f32 %v4711_v48, %v946_v42  ;;  %v4717_v22 = vld [vmem:[%s5266_s3 + $0x38] sm:$0xff] }
 0x31e   :  { %v3840_v20 = vpop.eup %3839  ;;  %v1915_v44 = vadd.f32 %v4741_v41, %v3407_v28 }
 0x31f   :  { %v1897_v19 = vmul.f32 %v3840_v20, %v1877_v26 }
 0x320   :  { %v3842_v24 = vpop.eup %3841 }
 0x321   :  { %v1900_v55 = vmul.f32 %v3842_v24, %v1880_v23  ;;  %v1908_v23 = vadd.f32 %v4717_v22, %v3400_v40 }
 0x322   :  { %v3844_v30 = vpop.eup %3843 }
 0x323   :  { %v1898_v62 = vmul.f32 %v3844_v30, %v1878_v29  ;;  %v1918_v27 = vpack.c.bf16 %v1900_v55, %v1899_v25  ;;  %v4723_v29 = vld [vmem:[%s5266_s3 + $0x28] sm:$0xff]  ;;  %v4729_v25 = vld [vmem:[%s5266_s3 + $0x18] sm:$0xff] }
 0x324   :  { %v1906_v30 = vadd.f32 %v4723_v29, %v965_v31  ;;  %v1904_v55 = vadd.f32 %v4729_v25, %v3396_v49  ;;  %v4747_v49 = vld [vmem:[%s5266_s3 + $0x60] sm:$0xff] }
 0x325   :  { %v1917_v5 = vpack.c.bf16 %v1898_v62, %v1897_v19  ;;  %3531 = vmatprep.subr.bf16.mxu1 %v1918_v27  ;;  %v994_v62 = vpop.f32.mrf.mxu0 }
 0x326   :  { %3532 = vmatpush3.bf16.msra.mxu1 %v1918_v27 }
 0x327   :  { %3533 = vmatprep.subr.bf16.mxu1 %v1917_v5  ;;  %v3408_v51 = vpop.f32.mrf.mxu0 }
 0x329   :  { %v997_v60 = vpop.f32.mrf.mxu0 }
 0x32a   :  { %3534 = vmatpush3.bf16.msra.mxu1 %v1917_v5  ;;  %v4735_v5 = vld [vmem:[%s5266_s3 + $0x8] sm:$0xff] }
 0x32b   :  { %v1902_v34 = vadd.f32 %v4735_v5, %v949_v4  ;;  %v1913_v4 = vadd.f32 %v4747_v49, %v994_v62 }
 0x32d   :  { %3536 = vmatmul.mubr.msk.bf16.vlgmr.msra.gmra.mxu1 %vm1321_vm1, %v4508_v43 }
 0x32e   :  { %3539 = vmatprep.mubr.msk.bf16.mxu1 %vm1321_vm1, %v4515_v1 }
 0x335   :  { %3540 = vmatmul.mubr.msk.bf16.gmra.mxu1 %vm1321_vm1, %v4522_v7 }
 0x336   :  { %3543 = vmatprep.mubr.msk.bf16.mxu1 %vm1321_vm1, %v4623_v33 }
 0x33d   :  { %3544 = vmatmul.mubr.msk.bf16.gmra.mxu1 %vm1321_vm1, %v4630_v8 }
 0x33e   :  { %3547 = vmatprep.mubr.msk.bf16.mxu1 %vm1321_vm1, %v4637_v32 }
 0x345   :  { %3548 = vmatmul.mubr.msk.bf16.gmra.mxu1 %vm1321_vm1, %v4644_v56 }
 0x346   :  { %3555 = vmatprep.mubr.msk.bf16.mxu1 %vm1321_vm1, %v4537_v46 }
 0x3ed   :  { %v3537_v61 = vpop.f32.mrf.mxu1 }
 0x3ee   :  { %v2018_v6 = vadd.f32 %v3537_v61, %v1903_v47  ;;  %v4753_v61 = vld [vmem:[%s5266_s3 + $0x78] sm:$0xff] }
 0x3ef   :  { %v1953_v59 = vpop.f32.mrf.mxu1 }
 0x3f0   :  { %3845 = vtanh.f32 %v2018_v6  ;;  %v2016_v26 = vadd.f32 %v1953_v59, %v1901_v12  ;;  %v1916_v59 = vadd.f32 %v4753_v61, %v3408_v51 }
 0x3f1   :  { %v3538_v11 = vpop.f32.mrf.mxu1 }
 0x3f2   :  { %v2019_v37 = vadd.f32 %v3538_v11, %v1904_v55 }
 0x3f3   :  { %v1956_v14 = vpop.f32.mrf.mxu1 }
 0x3f4   :  { %v2017_v38 = vadd.f32 %v1956_v14, %v1902_v34  ;;  %v4759_v14 = vld [vmem:[%s5266_s3 + $0x68] sm:$0xff] }
 0x3f5   :  { %v3541_v18 = vpop.f32.mrf.mxu1 }
 0x3f6   :  { %v2022_v58 = vadd.f32 %v3541_v18, %v1907_v17  ;;  %v1914_v18 = vadd.f32 %v4759_v14, %v997_v60 }
 0x3f7   :  { %v1969_v16 = vpop.f32.mrf.mxu1 }
 0x3f8   :  { %v2020_v20 = vadd.f32 %v1969_v16, %v1905_v0  ;;  %3847 = vtanh.f32 %v2022_v58  ;;  %v4765_v58 = vld [vmem:[%s5266_s3 + $0x50] sm:$0xff] }
 0x3f9   :  { %v3542_v2 = vpop.f32.mrf.mxu1 }
 0x3fa   :  { %v2023_v19 = vadd.f32 %v3542_v2, %v1908_v23  ;;  %3849 = vtanh.f32 %v2020_v20 }
 0x3fb   :  { %v1972_v13 = vpop.f32.mrf.mxu1  ;;  %3851 = vtanh.f32 %v2016_v26  ;;  %v4772_v26 = vld [vmem:[%s5266_s3 + $0x40] sm:$0xff] }
 0x3fc   :  { %v2021_v36 = vadd.f32 %v1972_v13, %v1906_v30  ;;  %3853 = vtanh.f32 %v2023_v19  ;;  %v1911_v13 = vadd.f32 %v4765_v58, %v4682_v54  ;;  %v1909_v30 = vadd.f32 %v4772_v26, %v4684_v10  ;;  %v4779_v54 = vld [vmem:[%s5266_s3 + $0x58] sm:$0xff] }
 0x3fd   :  { %v3545_v24 = vpop.f32.mrf.mxu1  ;;  %v3846_v47 = vpop.eup %3845  ;;  %v1912_v62 = vadd.f32 %v4779_v54, %v4686_v45 }
 0x3fe   :  { %3855 = vtanh.f32 %v2021_v36  ;;  %v2050_v23 = vmul.f32 0.5, %v3846_v47  ;;  %v2026_v34 = vadd.f32 %v3545_v24, %v1911_v13 }
 0x3ff   :  { %v1985_v27 = vpop.f32.mrf.mxu1  ;;  %3857 = vtanh.f32 %v2019_v37 }
 0x400   :  { %3859 = vtanh.f32 %v2017_v38  ;;  %v4786_v38 = vld [vmem:[%s5266_s3 + $0x48] sm:$0xff]  ;;  %v2054_v60 = vadd.f32 0.5, %v2050_v23 }
 0x401   :  { %v3546_v35 = vpop.f32.mrf.mxu1  ;;  %v1910_v10 = vadd.f32 %v4786_v38, %v4700_v52 }
 0x403   :  { %v1988_v53 = vpop.f32.mrf.mxu1 }
 0x404   :  { %v2025_v45 = vadd.f32 %v1988_v53, %v1910_v10 }
 0x405   :  { %v3549_v42 = vpop.f32.mrf.mxu1  ;;  %v3848_v2 = vpop.eup %3847 }
 0x406   :  { %v2030_v39 = vadd.f32 %v3549_v42, %v1915_v44  ;;  %v2058_v12 = vmul.f32 0.5, %v3848_v2  ;;  %v2024_v44 = vadd.f32 %v1985_v27, %v1909_v30 }
 0x407   :  { %v2001_v40 = vpop.f32.mrf.mxu1  ;;  %v3850_v0 = vpop.eup %3849 }
 0x408   :  { %3861 = vtanh.f32 %v2030_v39  ;;  %v2028_v31 = vadd.f32 %v2001_v40, %v1913_v4  ;;  %v3852_v28 = vpop.eup %3851  ;;  %v2056_v55 = vmul.f32 0.5, %v3850_v0  ;;  %v2062_v42 = vadd.f32 0.5, %v2058_v12 }
 0x409   :  { %v3550_v11 = vpop.f32.mrf.mxu1  ;;  %v3854_v20 = vpop.eup %3853  ;;  %v2048_v37 = vmul.f32 0.5, %v3852_v28  ;;  %v2027_v39 = vadd.f32 %v3546_v35, %v1912_v62 }
 0x40a   :  { %3863 = vtanh.f32 %v2028_v31  ;;  %v2031_v17 = vadd.f32 %v3550_v11, %v1916_v59  ;;  %v2059_v4 = vmul.f32 0.5, %v3854_v20  ;;  %v2060_v40 = vadd.f32 0.5, %v2056_v55 }
 0x40b   :  { %v2004_v16 = vpop.f32.mrf.mxu1  ;;  %v3856_v19 = vpop.eup %3855  ;;  %v2052_v11 = vadd.f32 0.5, %v2048_v37 }
 0x40c   :  { %v2029_v6 = vadd.f32 %v2004_v16, %v1914_v18  ;;  %3865 = vtanh.f32 %v2031_v17  ;;  %v3858_v36 = vpop.eup %3857  ;;  %v2057_v31 = vmul.f32 0.5, %v3856_v19  ;;  %v2074_v16 = vmul.f32 %v2062_v42, %v4600_v15 }
 0x40d   :  { %v3860_v51 = vpop.eup %3859  ;;  %v2051_v59 = vmul.f32 0.5, %v3858_v36  ;;  %v2063_v52 = vadd.f32 0.5, %v2059_v4  ;;  %v2072_v27 = vmul.f32 %v2060_v40, %v4602_v3 }
 0x40e   :  { %3867 = vtanh.f32 %v2029_v6  ;;  %v2049_v18 = vmul.f32 0.5, %v3860_v51  ;;  %v2061_v2 = vadd.f32 0.5, %v2057_v31 }
 0x40f   :  { %3869 = vtanh.f32 %v2026_v34  ;;  %v2055_v6 = vadd.f32 0.5, %v2051_v59  ;;  %v2075_v20 = vmul.f32 %v2063_v52, %v4607_v21  ;;  %v3706_v52 = vld [vmem:[%s5264_s1 + $0x170] sm:$0xff]  }
 0x410   :  { %3871 = vtanh.f32 %v2024_v44  ;;  %v2053_v13 = vadd.f32 0.5, %v2049_v18  ;;  %v2073_v15 = vmul.f32 %v2061_v2, %v4610_v57  ;;  %v3411_v2 = vpop.f32.mrf.mxu0 }
 0x411   :  { %3873 = vtanh.f32 %v2027_v39 }
 0x412   :  { %3875 = vtanh.f32 %v2025_v45 }
 0x415   :  { %v3862_v24 = vpop.eup %3861 }
 0x416   :  { %v2078_v47 = vmul.f32 %v3862_v24, %v2054_v60 }
 0x417   :  { %v3864_v17 = vpop.eup %3863 }
 0x418   :  { %v2076_v35 = vmul.f32 %v3864_v17, %v2052_v11  ;;  %v4792_v0 = vadd.f32 %v2078_v47, %v2074_v16  ;;  %v3704_v17 = vld [vmem:[%s5264_s1 + $0x160] sm:$0xff]   ;;  %v3705_v16 = vld [vmem:[%s5264_s1 + $0x168] sm:$0xff]  }
 0x419   :  { %v3866_v53 = vpop.eup %3865 }
 0x41a   :  { %v4794_v28 = vadd.f32 %v2076_v35, %v2072_v27  ;;  %v2079_v23 = vmul.f32 %v3866_v53, %v2055_v6  ;;  %3877 = vtanh.f32 %v4792_v0  ;;  %v3707_v27 = vld [vmem:[%s5264_s1 + $0x178] sm:$0xff]   ;;  %v1010_v35 = vpop.f32.mrf.mxu0 }
 0x41b   :  { %v3868_v12 = vpop.eup %3867 }
 0x41c   :  { %v2077_v30 = vmul.f32 %v3868_v12, %v2053_v13  ;;  %v4799_v3 = vadd.f32 %v2079_v23, %v2075_v20  ;;  %3879 = vtanh.f32 %v4794_v28  ;;  %v3870_v19 = vpop.eup %3869  ;;  %v3412_v6 = vpop.f32.mrf.mxu0 }
 0x41d   :  { %v3872_v62 = vpop.eup %3871  ;;  %v2066_v36 = vmul.f32 0.5, %v3870_v19 }
 0x41e   :  { %v4802_v55 = vadd.f32 %v2077_v30, %v2073_v15  ;;  %3881 = vtanh.f32 %v4799_v3  ;;  %v3874_v34 = vpop.eup %3873  ;;  %v2064_v57 = vmul.f32 0.5, %v3872_v62  ;;  %v1013_v53 = vpop.f32.mrf.mxu0 }
 0x41f   :  { %v3876_v21 = vpop.eup %3875  ;;  %v2067_v37 = vmul.f32 0.5, %v3874_v34  ;;  %v2070_v42 = vadd.f32 0.5, %v2066_v36 }
 0x420   :  { %3883 = vtanh.f32 %v4802_v55  ;;  %v2065_v10 = vmul.f32 0.5, %v3876_v21  ;;  %v2068_v60 = vadd.f32 0.5, %v2064_v57  ;;  %v3415_v13 = vpop.f32.mrf.mxu0  ;;  %v2094_v57 = vadd.f32 %v4691_v50, %v3411_v2 }
 0x421   :  { %v2071_v4 = vadd.f32 0.5, %v2067_v37 }
 0x422   :  { %v2069_v40 = vadd.f32 0.5, %v2065_v10  ;;  %v1026_v12 = vpop.f32.mrf.mxu0  ;;  %v2098_v10 = vadd.f32 %v4697_v9, %v3415_v13 }
 0x424   :  { %v3416_v20 = vpop.f32.mrf.mxu0 }
 0x426   :  { %v1029_v23 = vpop.f32.mrf.mxu0 }
 0x427   :  { %v3878_v44 = vpop.eup %3877 }
 0x428   :  { %v2090_v45 = vmul.f32 %v3878_v44, %v2070_v42  ;;  %v3419_v15 = vpop.f32.mrf.mxu0 }
 0x429   :  { %v3880_v51 = vpop.eup %3879 }
 0x42a   :  { %v2088_v59 = vmul.f32 %v3880_v51, %v2068_v60  ;;  %v4854_v62 = vpop.f32.mrf.mxu0 }
 0x42b   :  { %v3882_v39 = vpop.eup %3881 }
 0x42c   :  { %v2091_v24 = vmul.f32 %v3882_v39, %v2071_v4  ;;  %v4856_v36 = vpop.f32.mrf.mxu0  ;;  %v2096_v39 = vadd.f32 %v4705_v63, %v1026_v12 }
 0x42d   :  { %v3884_v31 = vpop.eup %3883 }
 0x42e   :  { %v2089_v11 = vmul.f32 %v3884_v31, %v2069_v40  ;;  %v2109_v18 = vpack.c.bf16 %v2091_v24, %v2090_v45  ;;  %v4860_v51 = vpop.f32.mrf.mxu0  ;;  %v2092_v45 = vadd.f32 %v4711_v48, %v1010_v35 }
 0x430   :  { %v2108_v47 = vpack.c.bf16 %v2089_v11, %v2088_v59  ;;  %3551 = vmatprep.subr.bf16.mxu1 %v2109_v18  ;;  %v3423_v31 = vpop.f32.mrf.mxu0  ;;  %v2099_v59 = vadd.f32 %v4717_v22, %v3416_v20 }
 0x431   :  { %3552 = vmatpush3.bf16.msra.mxu1 %v2109_v18  ;;  %v2106_v35 = vadd.f32 %v4741_v41, %v3423_v31 }
 0x432   :  { %3553 = vmatprep.subr.bf16.mxu1 %v2108_v47 }
 0x435   :  { %3554 = vmatpush3.bf16.msra.mxu1 %v2108_v47  ;;  %v2097_v47 = vadd.f32 %v4723_v29, %v1029_v23 }
 0x438   :  { %3556 = vmatmul.mubr.msk.bf16.vlgmr.msra.gmra.mxu1 %vm1321_vm1, %v4508_v43  ;;  %v3700_v43 = vld [vmem:[%s5264_s1 + $0x140] sm:$0xff]  }
 0x439   :  { %3559 = vmatprep.mubr.msk.bf16.mxu1 %vm1321_vm1, %v4515_v1  ;;  %v3701_v1 = vld [vmem:[%s5264_s1 + $0x148] sm:$0xff]   ;;  %3425 = vmatprep.mubr.msk.bf16.mxu0 %vm523_vm2, %v3700_v43  ;;  %v2095_v43 = vadd.f32 %v4729_v25, %v3412_v6 }
 0x43a   :  { %3426 = vmatmul.mubr.msk.bf16.gmra.mxu0 %vm523_vm2, %v3701_v1 }
 0x440   :  { %3560 = vmatmul.mubr.msk.bf16.gmra.mxu1 %vm1321_vm1, %v4522_v7  ;;  %v3702_v7 = vld [vmem:[%s5264_s1 + $0x150] sm:$0xff]  }
 0x441   :  { %3563 = vmatprep.mubr.msk.bf16.mxu1 %vm1321_vm1, %v4623_v33  ;;  %3429 = vmatprep.mubr.msk.bf16.mxu0 %vm523_vm2, %v3702_v7  ;;  %v1058_v7 = vpop.f32.mrf.mxu0 }
 0x442   :  { %v2104_v20 = vadd.f32 %v4747_v49, %v1058_v7 }
 0x443   :  { %v3424_v13 = vpop.f32.mrf.mxu0 }
 0x448   :  { %3564 = vmatmul.mubr.msk.bf16.gmra.mxu1 %vm1321_vm1, %v4630_v8 }
 0x449   :  { %3567 = vmatprep.mubr.msk.bf16.mxu1 %vm1321_vm1, %v4637_v32 }
 0x450   :  { %3568 = vmatmul.mubr.msk.bf16.gmra.mxu1 %vm1321_vm1, %v4644_v56 }
 0x451   :  { %3575 = vmatprep.mubr.msk.bf16.mxu1 %vm1321_vm1, %v4537_v46  ;;  %v3703_v46 = vld [vmem:[%s5264_s1 + $0x158] sm:$0xff]  }
 0x452   :  { %3430 = vmatmul.mubr.msk.bf16.gmra.mxu0 %vm523_vm2, %v3703_v46 }
 0x453   :  { %3433 = vmatprep.mubr.msk.bf16.mxu0 %vm523_vm2, %v3704_v17  ;;  %v2093_v17 = vadd.f32 %v4735_v5, %v1013_v53 }
 0x45a   :  { %3434 = vmatmul.mubr.msk.bf16.gmra.mxu0 %vm523_vm2, %v3705_v16 }
 0x45b   :  { %3437 = vmatprep.mubr.msk.bf16.mxu0 %vm523_vm2, %v3706_v52 }
 0x462   :  { %3438 = vmatmul.mubr.msk.bf16.gmra.mxu0 %vm523_vm2, %v3707_v27 }
 0x4f8   :  { %v3557_v30 = vpop.f32.mrf.mxu1 }
 0x4f9   :  { %v2209_v4 = vadd.f32 %v3557_v30, %v2094_v57  ;;  %v1061_v30 = vpop.f32.mrf.mxu0 }
 0x4fa   :  { %v2144_v19 = vpop.f32.mrf.mxu1 }
 0x4fb   :  { %3885 = vtanh.f32 %v2209_v4  ;;  %v2207_v18 = vadd.f32 %v2144_v19, %v2092_v45 }
 0x4fc   :  { %v3558_v34 = vpop.f32.mrf.mxu1 }
 0x4fd   :  { %v2210_v52 = vadd.f32 %v3558_v34, %v2095_v43  ;;  %v2107_v34 = vadd.f32 %v4753_v61, %v3424_v13  ;;  %v2103_v43 = vadd.f32 %v4779_v54, %v4856_v36 }
 0x4fe   :  { %v2147_v21 = vpop.f32.mrf.mxu1 }
 0x4ff   :  { %v2208_v2 = vadd.f32 %v2147_v21, %v2093_v17  ;;  %v2105_v21 = vadd.f32 %v4759_v14, %v1061_v30 }
 0x500   :  { %v3561_v37 = vpop.f32.mrf.mxu1 }
 0x501   :  { %v2213_v60 = vadd.f32 %v3561_v37, %v2098_v10 }
 0x502   :  { %v2160_v44 = vpop.f32.mrf.mxu1 }
 0x503   :  { %v2211_v24 = vadd.f32 %v2160_v44, %v2096_v39  ;;  %3887 = vtanh.f32 %v2213_v60  ;;  %v2102_v60 = vadd.f32 %v4765_v58, %v3419_v15  ;;  %v2101_v15 = vadd.f32 %v4786_v38, %v4860_v51 }
 0x504   :  { %v3562_v42 = vpop.f32.mrf.mxu1 }
 0x505   :  { %v2214_v1 = vadd.f32 %v3562_v42, %v2099_v59  ;;  %3889 = vtanh.f32 %v2211_v24  ;;  %v2100_v59 = vadd.f32 %v4772_v26, %v4854_v62 }
 0x506   :  { %v2163_v40 = vpop.f32.mrf.mxu1  ;;  %3891 = vtanh.f32 %v2207_v18 }
 0x507   :  { %v2212_v16 = vadd.f32 %v2163_v40, %v2097_v47  ;;  %3893 = vtanh.f32 %v2214_v1 }
 0x508   :  { %v3565_v11 = vpop.f32.mrf.mxu1  ;;  %v3886_v57 = vpop.eup %3885 }
 0x509   :  { %3895 = vtanh.f32 %v2212_v16  ;;  %v2241_v24 = vmul.f32 0.5, %v3886_v57  ;;  %v2217_v1 = vadd.f32 %v3565_v11, %v2102_v60 }
 0x50a   :  { %v2176_v46 = vpop.f32.mrf.mxu1  ;;  %3897 = vtanh.f32 %v2210_v52 }
 0x50b   :  { %3899 = vtanh.f32 %v2208_v2  ;;  %v2215_v16 = vadd.f32 %v2176_v46, %v2100_v59 }
 0x50c   :  { %v3566_v27 = vpop.f32.mrf.mxu1 }
 0x50d   :  { %v2218_v13 = vadd.f32 %v3566_v27, %v2103_v43 }
 0x50e   :  { %v2179_v12 = vpop.f32.mrf.mxu1 }
 0x50f   :  { %v2216_v62 = vadd.f32 %v2179_v12, %v2101_v15 }
 0x510   :  { %v3569_v6 = vpop.f32.mrf.mxu1  ;;  %v3888_v42 = vpop.eup %3887 }
 0x511   :  { %v2221_v23 = vadd.f32 %v3569_v6, %v2106_v35  ;;  %v2249_v31 = vmul.f32 0.5, %v3888_v42  ;;  %v2245_v6 = vadd.f32 0.5, %v2241_v24 }
 0x512   :  { %v2192_v53 = vpop.f32.mrf.mxu1  ;;  %v3890_v39 = vpop.eup %3889 }
 0x513   :  { %3901 = vtanh.f32 %v2221_v23  ;;  %v2219_v19 = vadd.f32 %v2192_v53, %v2104_v20  ;;  %v3892_v40 = vpop.eup %3891  ;;  %v2247_v18 = vmul.f32 0.5, %v3890_v39  ;;  %v2253_v2 = vadd.f32 0.5, %v2249_v31 }
 0x514   :  { %v3570_v37 = vpop.f32.mrf.mxu1  ;;  %v3894_v45 = vpop.eup %3893  ;;  %v2239_v17 = vmul.f32 0.5, %v3892_v40 }
 0x515   :  { %3903 = vtanh.f32 %v2219_v19  ;;  %v2222_v10 = vadd.f32 %v3570_v37, %v2107_v34  ;;  %v2250_v35 = vmul.f32 0.5, %v3894_v45  ;;  %v2251_v20 = vadd.f32 0.5, %v2247_v18 }
 0x516   :  { %v2195_v44 = vpop.f32.mrf.mxu1  ;;  %v3896_v47 = vpop.eup %3895  ;;  %v2243_v19 = vadd.f32 0.5, %v2239_v17  ;;  %v2265_v37 = vmul.f32 %v2253_v2, %v4792_v0 }
 0x517   :  { %v2220_v4 = vadd.f32 %v2195_v44, %v2105_v21  ;;  %3905 = vtanh.f32 %v2222_v10  ;;  %v3898_v7 = vpop.eup %3897  ;;  %v2248_v23 = vmul.f32 0.5, %v3896_v47  ;;  %v2254_v51 = vadd.f32 0.5, %v2250_v35 }
 0x518   :  { %v3900_v52 = vpop.eup %3899  ;;  %v2242_v53 = vmul.f32 0.5, %v3898_v7  ;;  %v2263_v46 = vmul.f32 %v2251_v20, %v4794_v28 }
 0x519   :  { %3907 = vtanh.f32 %v2220_v4  ;;  %v2240_v36 = vmul.f32 0.5, %v3900_v52  ;;  %v2252_v21 = vadd.f32 0.5, %v2248_v23  ;;  %v2266_v39 = vmul.f32 %v2254_v51, %v4799_v3  ;;  %v3714_v51 = vld [vmem:[%s5264_s1 + $0x1b0] sm:$0xff]  }
 0x51a   :  { %3909 = vtanh.f32 %v2217_v1  ;;  %v2246_v57 = vadd.f32 0.5, %v2242_v53  ;;  %v4898_v53 = vld [vmem:[%s5265_s2 + $0x8] sm:$0xff]  }
 0x51b   :  { %3911 = vtanh.f32 %v2215_v16  ;;  %v2244_v44 = vadd.f32 0.5, %v2240_v36  ;;  %v2264_v0 = vmul.f32 %v2252_v21, %v4802_v55  ;;  %v4912_v36 = vld [vmem:[%s5265_s2 + $0x18] sm:$0xff]   ;;  %v3427_v21 = vpop.f32.mrf.mxu0 }
 0x51c   :  { %3913 = vtanh.f32 %v2218_v13 }
 0x51d   :  { %3915 = vtanh.f32 %v2216_v62 }
 0x520   :  { %v3902_v30 = vpop.eup %3901 }
 0x521   :  { %v2269_v11 = vmul.f32 %v3902_v30, %v2245_v6 }
 0x522   :  { %v3904_v34 = vpop.eup %3903 }
 0x523   :  { %v2267_v27 = vmul.f32 %v3904_v34, %v2243_v19  ;;  %v4881_v10 = vadd.f32 %v2269_v11, %v2265_v37  ;;  %v4905_v19 = vld [vmem:[%s5265_s2 + $0x10] sm:$0xff]   ;;  %v4927_v11 = vld [vmem:[%s5265_s2] sm:$0xff]   ;;  %v3713_v37 = vld [vmem:[%s5264_s1 + $0x1a8] sm:$0xff]  }
 0x524   :  { %v3906_v12 = vpop.eup %3905  ;;  %v3712_v34 = vld [vmem:[%s5264_s1 + $0x1a0] sm:$0xff]  }
 0x525   :  { %v4883_v42 = vadd.f32 %v2267_v27, %v2263_v46  ;;  %v2270_v60 = vmul.f32 %v3906_v12, %v2246_v57  ;;  %3917 = vtanh.f32 %v4881_v10  ;;  %v3715_v46 = vld [vmem:[%s5264_s1 + $0x1b8] sm:$0xff]   ;;  %v1074_v27 = vpop.f32.mrf.mxu0 }
 0x526   :  { %v3908_v4 = vpop.eup %3907 }
 0x527   :  { %v2268_v40 = vmul.f32 %v3908_v4, %v2244_v44  ;;  %v4888_v28 = vadd.f32 %v2270_v60, %v2266_v39  ;;  %3919 = vtanh.f32 %v4883_v42  ;;  %v3910_v45 = vpop.eup %3909  ;;  %v3428_v57 = vpop.f32.mrf.mxu0 }
 0x528   :  { %v3912_v24 = vpop.eup %3911  ;;  %v2257_v18 = vmul.f32 0.5, %v3910_v45 }
 0x529   :  { %v4891_v31 = vadd.f32 %v2268_v40, %v2264_v0  ;;  %3921 = vtanh.f32 %v4888_v28  ;;  %v3914_v59 = vpop.eup %3913  ;;  %v2255_v55 = vmul.f32 0.5, %v3912_v24  ;;  %v1077_v12 = vpop.f32.mrf.mxu0 }
 0x52a   :  { %v3916_v3 = vpop.eup %3915  ;;  %v2258_v47 = vmul.f32 0.5, %v3914_v59  ;;  %v2261_v17 = vadd.f32 0.5, %v2257_v18 }
 0x52b   :  { %3923 = vtanh.f32 %v4891_v31  ;;  %v2256_v43 = vmul.f32 0.5, %v3916_v3  ;;  %v2259_v52 = vadd.f32 0.5, %v2255_v55  ;;  %v3431_v44 = vpop.f32.mrf.mxu0  ;;  %v2285_v55 = vadd.f32 %v4691_v50, %v3427_v21 }
 0x52c   :  { %v2262_v15 = vadd.f32 0.5, %v2258_v47 }
 0x52d   :  { %v2260_v2 = vadd.f32 0.5, %v2256_v43  ;;  %v1090_v4 = vpop.f32.mrf.mxu0  ;;  %v2289_v43 = vadd.f32 %v4697_v9, %v3431_v44 }
 0x52f   :  { %v3432_v39 = vpop.f32.mrf.mxu0 }
 0x531   :  { %v1093_v60 = vpop.f32.mrf.mxu0 }
 0x532   :  { %v3918_v1 = vpop.eup %3917  ;;  %v2288_v9 = vadd.f32 %v4723_v29, %v1093_v60 }
 0x533   :  { %v2281_v13 = vmul.f32 %v3918_v1, %v2261_v17  ;;  %v3435_v0 = vpop.f32.mrf.mxu0 }
 0x534   :  { %v3920_v7 = vpop.eup %3919 }
 0x535   :  { %v2279_v20 = vmul.f32 %v3920_v7, %v2259_v52  ;;  %v4963_v24 = vpop.f32.mrf.mxu0 }
 0x536   :  { %v3922_v16 = vpop.eup %3921 }
 0x537   :  { %v2282_v6 = vmul.f32 %v3922_v16, %v2262_v15  ;;  %v4965_v18 = vpop.f32.mrf.mxu0  ;;  %v2287_v16 = vadd.f32 %v4705_v63, %v1090_v4  ;;  %v2284_v63 = vadd.f32 %v4735_v5, %v1077_v12 }
 0x538   :  { %v3924_v35 = vpop.eup %3923 }
 0x539   :  { %v2280_v23 = vmul.f32 %v3924_v35, %v2260_v2  ;;  %v2300_v62 = vpack.c.bf16 %v2282_v6, %v2281_v13  ;;  %v4969_v7 = vpop.f32.mrf.mxu0  ;;  %v2283_v13 = vadd.f32 %v4711_v48, %v1074_v27 }
 0x53b   :  { %v2299_v30 = vpack.c.bf16 %v2280_v23, %v2279_v20  ;;  %3571 = vmatprep.subr.bf16.mxu1 %v2300_v62  ;;  %v3439_v35 = vpop.f32.mrf.mxu0  ;;  %v2290_v20 = vadd.f32 %v4717_v22, %v3432_v39 }
 0x53c   :  { %3572 = vmatpush3.bf16.msra.mxu1 %v2300_v62  ;;  %v2286_v62 = vadd.f32 %v4729_v25, %v3428_v57  ;;  %v2297_v22 = vadd.f32 %v4741_v41, %v3439_v35 }
 0x53d   :  { %3573 = vmatprep.subr.bf16.mxu1 %v2299_v30 }
 0x540   :  { %3574 = vmatpush3.bf16.msra.mxu1 %v2299_v30 }
 0x543   :  { %3576 = vmatmul.mubr.msk.bf16.vlgmr.msra.gmra.mxu1 %vm1321_vm1, %v4898_v53 }
 0x544   :  { %3579 = vmatprep.mubr.msk.bf16.mxu1 %vm1321_vm1, %v4905_v19 }
 0x54b   :  { %3580 = vmatmul.mubr.msk.bf16.gmra.mxu1 %vm1321_vm1, %v4912_v36 }
 0x54c   :  { %3583 = vmatprep.mubr.msk.bf16.mxu1 %vm1321_vm1, %v4623_v33  ;;  %v3708_v33 = vld [vmem:[%s5264_s1 + $0x180] sm:$0xff]  }
 0x54d   :  { %3441 = vmatprep.mubr.msk.bf16.mxu0 %vm523_vm2, %v3708_v33  ;;  %v1122_v33 = vpop.f32.mrf.mxu0 }
 0x54e   :  { %v2295_v25 = vadd.f32 %v4747_v49, %v1122_v33 }
 0x553   :  { %3584 = vmatmul.mubr.msk.bf16.gmra.mxu1 %vm1321_vm1, %v4630_v8  ;;  %v3709_v8 = vld [vmem:[%s5264_s1 + $0x188] sm:$0xff]  }
 0x554   :  { %3587 = vmatprep.mubr.msk.bf16.mxu1 %vm1321_vm1, %v4637_v32  ;;  %3442 = vmatmul.mubr.msk.bf16.gmra.mxu0 %vm523_vm2, %v3709_v8  ;;  %v3710_v32 = vld [vmem:[%s5264_s1 + $0x190] sm:$0xff]  }
 0x555   :  { %3445 = vmatprep.mubr.msk.bf16.mxu0 %vm523_vm2, %v3710_v32 }
 0x55b   :  { %3588 = vmatmul.mubr.msk.bf16.gmra.mxu1 %vm1321_vm1, %v4644_v56  ;;  %v3711_v56 = vld [vmem:[%s5264_s1 + $0x198] sm:$0xff]  }
 0x55c   :  { %3595 = vmatprep.mubr.msk.bf16.mxu1 %vm1321_vm1, %v4927_v11  ;;  %3446 = vmatmul.mubr.msk.bf16.gmra.mxu0 %vm523_vm2, %v3711_v56 }
 0x55d   :  { %3449 = vmatprep.mubr.msk.bf16.mxu0 %vm523_vm2, %v3712_v34 }
 0x564   :  { %3450 = vmatmul.mubr.msk.bf16.gmra.mxu0 %vm523_vm2, %v3713_v37  ;;  %v3440_v37 = vpop.f32.mrf.mxu0 }
 0x565   :  { %3453 = vmatprep.mubr.msk.bf16.mxu0 %vm523_vm2, %v3714_v51  ;;  %v2298_v57 = vadd.f32 %v4753_v61, %v3440_v37  ;;  %v2291_v61 = vadd.f32 %v4772_v26, %v4963_v24 }
 0x566   :  { %v1125_v21 = vpop.f32.mrf.mxu0 }
 0x567   :  { %v2296_v44 = vadd.f32 %v4759_v14, %v1125_v21 }
 0x56c   :  { %3454 = vmatmul.mubr.msk.bf16.gmra.mxu0 %vm523_vm2, %v3715_v46 }
 0x603   :  { %v3577_v40 = vpop.f32.mrf.mxu1 }
 0x604   :  { %v2400_v15 = vadd.f32 %v3577_v40, %v2285_v55 }
 0x605   :  { %v2335_v45 = vpop.f32.mrf.mxu1 }
 0x606   :  { %3925 = vtanh.f32 %v2400_v15  ;;  %v2398_v50 = vadd.f32 %v2335_v45, %v2283_v13 }
 0x607   :  { %v3578_v59 = vpop.f32.mrf.mxu1 }
 0x608   :  { %v2401_v56 = vadd.f32 %v3578_v59, %v2286_v62  ;;  %v2293_v59 = vadd.f32 %v4765_v58, %v3435_v0  ;;  %v2292_v58 = vadd.f32 %v4786_v38, %v4969_v7 }
 0x609   :  { %v2338_v3 = vpop.f32.mrf.mxu1 }
 0x60a   :  { %v2399_v34 = vadd.f32 %v2338_v3, %v2284_v63 }
 0x60b   :  { %v3581_v47 = vpop.f32.mrf.mxu1 }
 0x60c   :  { %v2404_v52 = vadd.f32 %v3581_v47, %v2289_v43 }
 0x60d   :  { %v2351_v1 = vpop.f32.mrf.mxu1 }
 0x60e   :  { %v2402_v6 = vadd.f32 %v2351_v1, %v2287_v16  ;;  %3927 = vtanh.f32 %v2404_v52  ;;  %v2294_v1 = vadd.f32 %v4779_v54, %v4965_v18 }
 0x60f   :  { %v3582_v17 = vpop.f32.mrf.mxu1 }
 0x610   :  { %v2405_v30 = vadd.f32 %v3582_v17, %v2290_v20  ;;  %3929 = vtanh.f32 %v2402_v6 }
 0x611   :  { %v2354_v2 = vpop.f32.mrf.mxu1  ;;  %3931 = vtanh.f32 %v2398_v50 }
 0x612   :  { %v2403_v32 = vadd.f32 %v2354_v2, %v2288_v9  ;;  %3933 = vtanh.f32 %v2405_v30 }
 0x613   :  { %v3585_v23 = vpop.f32.mrf.mxu1  ;;  %v3926_v41 = vpop.eup %3925 }
 0x614   :  { %3935 = vtanh.f32 %v2403_v32  ;;  %v2432_v55 = vmul.f32 0.5, %v3926_v41  ;;  %v2408_v17 = vadd.f32 %v3585_v23, %v2293_v59 }
 0x615   :  { %v2367_v8 = vpop.f32.mrf.mxu1  ;;  %3937 = vtanh.f32 %v2401_v56 }
 0x616   :  { %3939 = vtanh.f32 %v2399_v34  ;;  %v2406_v0 = vadd.f32 %v2367_v8, %v2291_v61  ;;  %v2436_v6 = vadd.f32 0.5, %v2432_v55 }
 0x617   :  { %v3586_v48 = vpop.f32.mrf.mxu1 }
 0x618   :  { %v2409_v13 = vadd.f32 %v3586_v48, %v2294_v1  ;;  %v5020_v1 = vld [vmem:[%s5265_s2 + $0x28] sm:$0xff]  }
 0x619   :  { %v2370_v51 = vpop.f32.mrf.mxu1 }
 0x61a   :  { %v2407_v26 = vadd.f32 %v2370_v51, %v2292_v58  ;;  %v3717_v58 = vld [vmem:[%s5264_s1 + $0x1c8] sm:$0xff]  }
 0x61b   :  { %v3589_v29 = vpop.f32.mrf.mxu1  ;;  %v3928_v60 = vpop.eup %3927 }
 0x61c   :  { %v2412_v46 = vadd.f32 %v3589_v29, %v2297_v22  ;;  %v2440_v3 = vmul.f32 0.5, %v3928_v60 }
 0x61d   :  { %v2383_v5 = vpop.f32.mrf.mxu1  ;;  %v3930_v45 = vpop.eup %3929 }
 0x61e   :  { %3941 = vtanh.f32 %v2412_v46  ;;  %v2410_v27 = vadd.f32 %v2383_v5, %v2295_v25  ;;  %v3932_v49 = vpop.eup %3931  ;;  %v2438_v43 = vmul.f32 0.5, %v3930_v45  ;;  %v2444_v2 = vadd.f32 0.5, %v2440_v3 }
 0x61f   :  { %v3590_v12 = vpop.f32.mrf.mxu1  ;;  %v3934_v47 = vpop.eup %3933  ;;  %v2430_v16 = vmul.f32 0.5, %v3932_v49 }
 0x620   :  { %3943 = vtanh.f32 %v2410_v27  ;;  %v2413_v4 = vadd.f32 %v3590_v12, %v2298_v57  ;;  %v2441_v35 = vmul.f32 0.5, %v3934_v47  ;;  %v2442_v20 = vadd.f32 0.5, %v2438_v43 }
 0x621   :  { %v2386_v39 = vpop.f32.mrf.mxu1  ;;  %v3936_v14 = vpop.eup %3935  ;;  %v2434_v62 = vadd.f32 0.5, %v2430_v16  ;;  %v2456_v30 = vmul.f32 %v2444_v2, %v4881_v10  ;;  %v3716_v16 = vld [vmem:[%s5264_s1 + $0x1c0] sm:$0xff]   ;;  %v3721_v2 = vld [vmem:[%s5264_s1 + $0x1e8] sm:$0xff]  }
 0x622   :  { %v2411_v40 = vadd.f32 %v2386_v39, %v2296_v44  ;;  %3945 = vtanh.f32 %v2413_v4  ;;  %v3938_v15 = vpop.eup %3937  ;;  %v2439_v50 = vmul.f32 0.5, %v3936_v14  ;;  %v2445_v38 = vadd.f32 0.5, %v2441_v35  ;;  %v5013_v14 = vld [vmem:[%s5265_s2 + $0x20] sm:$0xff]   ;;  %3457 = vmatprep.mubr.msk.bf16.mxu0 %vm523_vm2, %v3716_v16  ;;  %v3722_v35 = vld [vmem:[%s5264_s1 + $0x1f0] sm:$0xff]  }
 0x623   :  { %v3940_v52 = vpop.eup %3939  ;;  %v2433_v9 = vmul.f32 0.5, %v3938_v15  ;;  %v2454_v7 = vmul.f32 %v2442_v20, %v4883_v42  ;;  %v5034_v15 = vld [vmem:[%s5265_s2 + $0x38] sm:$0xff]   ;;  %3458 = vmatmul.mubr.msk.bf16.gmra.mxu0 %vm523_vm2, %v3717_v58 }
 0x624   :  { %3947 = vtanh.f32 %v2411_v40  ;;  %v2431_v54 = vmul.f32 0.5, %v3940_v52  ;;  %v2443_v33 = vadd.f32 0.5, %v2439_v50  ;;  %v2457_v37 = vmul.f32 %v2445_v38, %v4888_v28  ;;  %v3720_v52 = vld [vmem:[%s5264_s1 + $0x1e0] sm:$0xff]  }
 0x625   :  { %3949 = vtanh.f32 %v2408_v17  ;;  %v2437_v63 = vadd.f32 0.5, %v2433_v9  ;;  %v5027_v17 = vld [vmem:[%s5265_s2 + $0x30] sm:$0xff]  }
 0x626   :  { %3951 = vtanh.f32 %v2406_v0  ;;  %v2435_v48 = vadd.f32 0.5, %v2431_v54  ;;  %v2455_v10 = vmul.f32 %v2443_v33, %v4891_v31  ;;  %v3718_v0 = vld [vmem:[%s5264_s1 + $0x1d0] sm:$0xff]  }
 0x627   :  { %3953 = vtanh.f32 %v2409_v13  ;;  %3461 = vmatprep.mubr.msk.bf16.mxu0 %vm523_vm2, %v3718_v0  ;;  %v3723_v13 = vld [vmem:[%s5264_s1 + $0x1f8] sm:$0xff]  }
 0x628   :  { %3955 = vtanh.f32 %v2407_v26 }
 0x62b   :  { %v3942_v24 = vpop.eup %3941 }
 0x62c   :  { %v2460_v18 = vmul.f32 %v3942_v24, %v2436_v6  ;;  %v3443_v6 = vpop.f32.mrf.mxu0 }
 0x62d   :  { %v3944_v23 = vpop.eup %3943 }
 0x62e   :  { %v2458_v8 = vmul.f32 %v3944_v23, %v2434_v62  ;;  %v4990_v32 = vadd.f32 %v2460_v18, %v2456_v30  ;;  %v1138_v20 = vpop.f32.mrf.mxu0 }
 0x62f   :  { %v3946_v56 = vpop.eup %3945 }
 0x630   :  { %v4992_v34 = vadd.f32 %v2458_v8, %v2454_v7  ;;  %v2461_v51 = vmul.f32 %v3946_v56, %v2437_v63  ;;  %3957 = vtanh.f32 %v4990_v32  ;;  %v3444_v50 = vpop.f32.mrf.mxu0  ;;  %v5081_v56 = vld [vmem:[%s5266_s3 + $0x10] sm:$0xff] }
 0x631   :  { %v3948_v22 = vpop.eup %3947 }
 0x632   :  { %v2459_v29 = vmul.f32 %v3948_v22, %v2435_v48  ;;  %v4997_v42 = vadd.f32 %v2461_v51, %v2457_v37  ;;  %3959 = vtanh.f32 %v4992_v34  ;;  %v3950_v46 = vpop.eup %3949  ;;  %v1141_v26 = vpop.f32.mrf.mxu0  ;;  %v2476_v48 = vadd.f32 %v5081_v56, %v3443_v6  ;;  %v5087_v22 = vld [vmem:[%s5266_s3 + $0x30] sm:$0xff] }
 0x633   :  { %v3952_v21 = vpop.eup %3951  ;;  %v2448_v27 = vmul.f32 0.5, %v3950_v46 }
 0x634   :  { %v5000_v25 = vadd.f32 %v2459_v29, %v2455_v10  ;;  %3961 = vtanh.f32 %v4997_v42  ;;  %v3954_v5 = vpop.eup %3953  ;;  %v2446_v31 = vmul.f32 0.5, %v3952_v21  ;;  %v3447_v24 = vpop.f32.mrf.mxu0  ;;  %v5095_v21 = vld [vmem:[%s5266_s3 + $0x20] sm:$0xff] }
 0x635   :  { %v3956_v28 = vpop.eup %3955  ;;  %v2449_v57 = vmul.f32 0.5, %v3954_v5  ;;  %v2452_v4 = vadd.f32 0.5, %v2448_v27  ;;  %v2480_v37 = vadd.f32 %v5087_v22, %v3447_v24 }
 0x636   :  { %3963 = vtanh.f32 %v5000_v25  ;;  %v2447_v12 = vmul.f32 0.5, %v3956_v28  ;;  %v2450_v40 = vadd.f32 0.5, %v2446_v31  ;;  %v1154_v9 = vpop.f32.mrf.mxu0  ;;  %v5101_v31 = vld [vmem:[%s5266_s3] sm:$0xff] }
 0x637   :  { %v2453_v39 = vadd.f32 0.5, %v2449_v57  ;;  %v2478_v5 = vadd.f32 %v5095_v21, %v1154_v9 }
 0x638   :  { %v2451_v45 = vadd.f32 0.5, %v2447_v12  ;;  %v3448_v62 = vpop.f32.mrf.mxu0  ;;  %v2474_v12 = vadd.f32 %v5101_v31, %v1138_v20  ;;  %v5137_v20 = vld [vmem:[%s5266_s3 + $0x60] sm:$0xff] }
 0x63a   :  { %v1157_v54 = vpop.f32.mrf.mxu0 }
 0x63c   :  { %v5072_v18 = vpop.f32.mrf.mxu0 }
 0x63d   :  { %v3958_v44 = vpop.eup %3957 }
 0x63e   :  { %v2472_v49 = vmul.f32 %v3958_v44, %v2452_v4  ;;  %v5074_v38 = vpop.f32.mrf.mxu0 }
 0x63f   :  { %v3960_v41 = vpop.eup %3959 }
 0x640   :  { %v2470_v47 = vmul.f32 %v3960_v41, %v2450_v40  ;;  %v5076_v8 = vpop.f32.mrf.mxu0  ;;  %v5107_v41 = vld [vmem:[%s5266_s3 + $0x38] sm:$0xff]  ;;  %v5113_v40 = vld [vmem:[%s5266_s3 + $0x28] sm:$0xff] }
 0x641   :  { %v3962_v60 = vpop.eup %3961  ;;  %v2481_v4 = vadd.f32 %v5107_v41, %v3448_v62 }
 0x642   :  { %v2473_v3 = vmul.f32 %v3962_v60, %v2453_v39  ;;  %v5090_v10 = vpop.f32.mrf.mxu0 }
 0x643   :  { %v3964_v59 = vpop.eup %3963 }
 0x644   :  { %v2471_v55 = vmul.f32 %v3964_v59, %v2451_v45  ;;  %v2491_v61 = vpack.c.bf16 %v2473_v3, %v2472_v49  ;;  %v3455_v57 = vpop.f32.mrf.mxu0  ;;  %v2479_v45 = vadd.f32 %v5113_v40, %v1157_v54  ;;  %v5119_v59 = vld [vmem:[%s5266_s3 + $0x18] sm:$0xff] }
 0x645   :  { %v2477_v49 = vadd.f32 %v5119_v59, %v3444_v50  ;;  %v5143_v54 = vld [vmem:[%s5266_s3 + $0x78] sm:$0xff] }
 0x646   :  { %v2490_v43 = vpack.c.bf16 %v2471_v55, %v2470_v47  ;;  %3591 = vmatprep.subr.bf16.mxu1 %v2491_v61  ;;  %v1186_v47 = vpop.f32.mrf.mxu0 }
 0x647   :  { %3592 = vmatpush3.bf16.msra.mxu1 %v2491_v61  ;;  %v5125_v61 = vld [vmem:[%s5266_s3 + $0x8] sm:$0xff]  ;;  %v2486_v50 = vadd.f32 %v5137_v20, %v1186_v47 }
 0x648   :  { %3593 = vmatprep.subr.bf16.mxu1 %v2490_v43 }
 0x64b   :  { %3594 = vmatpush3.bf16.msra.mxu1 %v2490_v43  ;;  %v2475_v43 = vadd.f32 %v5125_v61, %v1141_v26 }
 0x64e   :  { %3596 = vmatmul.mubr.msk.bf16.vlgmr.msra.gmra.mxu1 %vm1321_vm1, %v4898_v53 }
 0x64f   :  { %3599 = vmatprep.mubr.msk.bf16.mxu1 %vm1321_vm1, %v4905_v19 }
 0x656   :  { %3600 = vmatmul.mubr.msk.bf16.gmra.mxu1 %vm1321_vm1, %v4912_v36 }
 0x657   :  { %3603 = vmatprep.mubr.msk.bf16.mxu1 %vm1321_vm1, %v5013_v14 }
 0x65e   :  { %3604 = vmatmul.mubr.msk.bf16.gmra.mxu1 %vm1321_vm1, %v5020_v1 }
 0x65f   :  { %3607 = vmatprep.mubr.msk.bf16.mxu1 %vm1321_vm1, %v5027_v17 }
 0x666   :  { %3608 = vmatmul.mubr.msk.bf16.gmra.mxu1 %vm1321_vm1, %v5034_v15 }
 0x667   :  { %3615 = vmatprep.mubr.msk.bf16.mxu1 %vm1321_vm1, %v4927_v11  ;;  %v3719_v11 = vld [vmem:[%s5264_s1 + $0x1d8] sm:$0xff]  }
 0x668   :  { %3462 = vmatmul.mubr.msk.bf16.gmra.mxu0 %vm523_vm2, %v3719_v11 }
 0x669   :  { %3465 = vmatprep.mubr.msk.bf16.mxu0 %vm523_vm2, %v3720_v52  ;;  %v5131_v52 = vld [vmem:[%s5266_s3 + $0x70] sm:$0xff] }
 0x670   :  { %3466 = vmatmul.mubr.msk.bf16.gmra.mxu0 %vm523_vm2, %v3721_v2  ;;  %v2488_v2 = vadd.f32 %v5131_v52, %v3455_v57 }
 0x671   :  { %3469 = vmatprep.mubr.msk.bf16.mxu0 %vm523_vm2, %v3722_v35  ;;  %v3456_v35 = vpop.f32.mrf.mxu0 }
 0x673   :  { %v1189_v24 = vpop.f32.mrf.mxu0 }
 0x678   :  { %3470 = vmatmul.mubr.msk.bf16.gmra.mxu0 %vm523_vm2, %v3723_v13 }
 0x70e   :  { %v3597_v23 = vpop.f32.mrf.mxu1 }
 0x70f   :  { %v2591_v46 = vadd.f32 %v3597_v23, %v2476_v48  ;;  %v2489_v23 = vadd.f32 %v5143_v54, %v3456_v35 }
 0x710   :  { %v2526_v30 = vpop.f32.mrf.mxu1 }
 0x711   :  { %3965 = vtanh.f32 %v2591_v46  ;;  %v2589_v60 = vadd.f32 %v2526_v30, %v2474_v12 }
 0x712   :  { %v3598_v7 = vpop.f32.mrf.mxu1 }
 0x713   :  { %v2592_v58 = vadd.f32 %v3598_v7, %v2477_v49  ;;  %v5149_v7 = vld [vmem:[%s5266_s3 + $0x68] sm:$0xff] }
 0x714   :  { %v2529_v33 = vpop.f32.mrf.mxu1 }
 0x715   :  { %v2590_v11 = vadd.f32 %v2529_v33, %v2475_v43  ;;  %v2487_v33 = vadd.f32 %v5149_v7, %v1189_v24 }
 0x716   :  { %v3601_v63 = vpop.f32.mrf.mxu1 }
 0x717   :  { %v2595_v28 = vadd.f32 %v3601_v63, %v2480_v37 }
 0x718   :  { %v2542_v51 = vpop.f32.mrf.mxu1 }
 0x719   :  { %v2593_v44 = vadd.f32 %v2542_v51, %v2478_v5  ;;  %3967 = vtanh.f32 %v2595_v28  ;;  %v5155_v5 = vld [vmem:[%s5266_s3 + $0x50] sm:$0xff] }
 0x71a   :  { %v3602_v29 = vpop.f32.mrf.mxu1  ;;  %v2484_v28 = vadd.f32 %v5155_v5, %v5072_v18  ;;  %v5169_v18 = vld [vmem:[%s5266_s3 + $0x58] sm:$0xff] }
 0x71b   :  { %v2596_v3 = vadd.f32 %v3602_v29, %v2481_v4  ;;  %3969 = vtanh.f32 %v2593_v44  ;;  %v5162_v4 = vld [vmem:[%s5266_s3 + $0x40] sm:$0xff] }
 0x71c   :  { %v2545_v27 = vpop.f32.mrf.mxu1  ;;  %3971 = vtanh.f32 %v2589_v60  ;;  %v2482_v60 = vadd.f32 %v5162_v4, %v5074_v38 }
 0x71d   :  { %v2594_v16 = vadd.f32 %v2545_v27, %v2479_v45  ;;  %3973 = vtanh.f32 %v2596_v3  ;;  %v2485_v3 = vadd.f32 %v5169_v18, %v5076_v8 }
 0x71e   :  { %v3605_v39 = vpop.f32.mrf.mxu1  ;;  %v3966_v63 = vpop.eup %3965 }
 0x71f   :  { %3975 = vtanh.f32 %v2594_v16  ;;  %v2623_v44 = vmul.f32 0.5, %v3966_v63  ;;  %v2599_v47 = vadd.f32 %v3605_v39, %v2484_v28 }
 0x720   :  { %v2558_v55 = vpop.f32.mrf.mxu1  ;;  %3977 = vtanh.f32 %v2592_v58  ;;  %v5176_v58 = vld [vmem:[%s5266_s3 + $0x48] sm:$0xff] }
 0x721   :  { %3979 = vtanh.f32 %v2590_v11  ;;  %v2483_v38 = vadd.f32 %v5176_v58, %v5090_v10  ;;  %v2597_v11 = vadd.f32 %v2558_v55, %v2482_v60 }
 0x722   :  { %v3606_v0 = vpop.f32.mrf.mxu1 }
 0x724   :  { %v2561_v13 = vpop.f32.mrf.mxu1 }
 0x725   :  { %v2598_v8 = vadd.f32 %v2561_v13, %v2483_v38 }
 0x726   :  { %v3609_v6 = vpop.f32.mrf.mxu1  ;;  %v3968_v51 = vpop.eup %3967 }
 0x727   :  { %v2603_v26 = vadd.f32 %v3609_v6, %v2488_v2  ;;  %v2631_v57 = vmul.f32 0.5, %v3968_v51 }
 0x728   :  { %v2574_v9 = vpop.f32.mrf.mxu1  ;;  %v3970_v46 = vpop.eup %3969 }
 0x729   :  { %3981 = vtanh.f32 %v2603_v26  ;;  %v2601_v62 = vadd.f32 %v2574_v9, %v2486_v50  ;;  %v3972_v27 = vpop.eup %3971  ;;  %v2629_v45 = vmul.f32 0.5, %v3970_v46  ;;  %v2635_v35 = vadd.f32 0.5, %v2631_v57 }
 0x72a   :  { %v3610_v30 = vpop.f32.mrf.mxu1  ;;  %v3974_v12 = vpop.eup %3973  ;;  %v2621_v16 = vmul.f32 0.5, %v3972_v27  ;;  %v2600_v50 = vadd.f32 %v3606_v0, %v2485_v3  ;;  %v2627_v26 = vadd.f32 0.5, %v2623_v44 }
 0x72b   :  { %3983 = vtanh.f32 %v2601_v62  ;;  %v2604_v48 = vadd.f32 %v3610_v30, %v2489_v23  ;;  %v2632_v6 = vmul.f32 0.5, %v3974_v12  ;;  %v2633_v24 = vadd.f32 0.5, %v2629_v45 }
 0x72c   :  { %v2577_v37 = vpop.f32.mrf.mxu1  ;;  %v3976_v49 = vpop.eup %3975  ;;  %v2625_v23 = vadd.f32 0.5, %v2621_v16 }
 0x72d   :  { %v2602_v29 = vadd.f32 %v2577_v37, %v2487_v33  ;;  %3985 = vtanh.f32 %v2604_v48  ;;  %v3978_v43 = vpop.eup %3977  ;;  %v2630_v9 = vmul.f32 0.5, %v3976_v49  ;;  %v2647_v48 = vmul.f32 %v2635_v35, %v4990_v32 }
 0x72e   :  { %v3980_v2 = vpop.eup %3979  ;;  %v2624_v62 = vmul.f32 0.5, %v3978_v43  ;;  %v2636_v10 = vadd.f32 0.5, %v2632_v6  ;;  %v2645_v55 = vmul.f32 %v2633_v24, %v4992_v34 }
 0x72f   :  { %3987 = vtanh.f32 %v2602_v29  ;;  %v2622_v30 = vmul.f32 0.5, %v3980_v2  ;;  %v2634_v37 = vadd.f32 0.5, %v2630_v9 }
 0x730   :  { %3989 = vtanh.f32 %v2599_v47  ;;  %v2628_v51 = vadd.f32 0.5, %v2624_v62  ;;  %v2648_v57 = vmul.f32 %v2636_v10, %v4997_v42 }
 0x731   :  { %3991 = vtanh.f32 %v2597_v11  ;;  %v2626_v46 = vadd.f32 0.5, %v2622_v30  ;;  %v2646_v32 = vmul.f32 %v2634_v37, %v5000_v25 }
 0x732   :  { %3993 = vtanh.f32 %v2600_v50 }
 0x733   :  { %3995 = vtanh.f32 %v2598_v8 }
 0x736   :  { %v3982_v39 = vpop.eup %3981 }
 0x737   :  { %v2651_v33 = vmul.f32 %v3982_v39, %v2627_v26 }
 0x738   :  { %v3984_v63 = vpop.eup %3983 }
 0x739   :  { %v2649_v0 = vmul.f32 %v3984_v63, %v2625_v23  ;;  %v5182_v29 = vadd.f32 %v2651_v33, %v2647_v48  ;;  %v4120_v33 = vmov 0.0  }
 0x73a   :  { %v3986_v13 = vpop.eup %3985  ;;  %3639 = vmatprep.subr.bf16.mxu0 %v4120_v33  ;;  %3641 = vmatprep.mubr.msk.bf16.mxu0 %vm4121_vm3, %v4120_v33 }
 0x73b   :  { %v5184_v28 = vadd.f32 %v2649_v0, %v2645_v55  ;;  %v2652_v12 = vmul.f32 %v3986_v13, %v2628_v51  ;;  %3997 = vtanh.f32 %v5182_v29 }
 0x73c   :  { %v3988_v27 = vpop.eup %3987 }
 0x73d   :  { %v2650_v44 = vmul.f32 %v3988_v27, %v2626_v46  ;;  %v5189_v34 = vadd.f32 %v2652_v12, %v2648_v57  ;;  %3999 = vtanh.f32 %v5184_v28  ;;  %v3990_v45 = vpop.eup %3989 }
 0x73e   :  { %v3992_v49 = vpop.eup %3991  ;;  %v2639_v47 = vmul.f32 0.5, %v3990_v45 }
 0x73f   :  { %v5192_v60 = vadd.f32 %v2650_v44, %v2646_v32  ;;  %4001 = vtanh.f32 %v5189_v34  ;;  %v3994_v3 = vpop.eup %3993  ;;  %v2637_v25 = vmul.f32 0.5, %v3992_v49 }
 0x740   :  { %v3996_v42 = vpop.eup %3995  ;;  %v2640_v43 = vmul.f32 0.5, %v3994_v3  ;;  %v2643_v2 = vadd.f32 0.5, %v2639_v47 }
 0x741   :  { %4003 = vtanh.f32 %v5192_v60  ;;  %v2638_v16 = vmul.f32 0.5, %v3996_v42  ;;  %v2641_v50 = vadd.f32 0.5, %v2637_v25 }
 0x742   :  { %v2644_v35 = vadd.f32 0.5, %v2640_v43 }
 0x743   :  { %v2642_v26 = vadd.f32 0.5, %v2638_v16 }
 0x748   :  { %v3998_v38 = vpop.eup %3997 }
 0x749   :  { %v2663_v9 = vmul.f32 %v3998_v38, %v2643_v2 }
 0x74a   :  { %v4000_v11 = vpop.eup %3999 }
 0x74b   :  { %v2661_v39 = vmul.f32 %v4000_v11, %v2641_v50 }
 0x74c   :  { %v4002_v6 = vpop.eup %4001 }
 0x74d   :  { %v2664_v8 = vmul.f32 %v4002_v6, %v2644_v35 }
 0x74e   :  { %v4004_v24 = vpop.eup %4003 }
 0x74f   :  { %v2662_v62 = vmul.f32 %v4004_v24, %v2642_v26  ;;  %v2682_v23 = vpack.c.bf16 %v2664_v8, %v2663_v9 }
 0x751   :  { %v2681_v30 = vpack.c.bf16 %v2662_v62, %v2661_v39  ;;  %3611 = vmatprep.subr.bf16.mxu1 %v2682_v23 }
 0x752   :  { %3612 = vmatpush3.bf16.msra.mxu1 %v2682_v23 }
 0x753   :  { %3613 = vmatprep.subr.bf16.mxu1 %v2681_v30 }
 0x756   :  { %3614 = vmatpush3.bf16.msra.mxu1 %v2681_v30 }
 0x757   :  { %3631 = vmatprep.subr.bf16.mxu1 %v4120_v33 }
 0x759   :  { %3616 = vmatmul.mubr.msk.bf16.vlgmr.msra.gmra.mxu1 %vm1321_vm1, %v4898_v53  ;;  %v3459_v53 = vpop.f32.mrf.mxu0 }
 0x75a   :  { %3619 = vmatprep.mubr.msk.bf16.mxu1 %vm1321_vm1, %v4905_v19  ;;  %v2667_v32 = vadd.f32 %v5081_v56, %v3459_v53 }
 0x75b   :  { %v1202_v19 = vpop.f32.mrf.mxu0 }
 0x75c   :  { %v2665_v45 = vadd.f32 %v5101_v31, %v1202_v19 }
 0x761   :  { %3620 = vmatmul.mubr.msk.bf16.gmra.mxu1 %vm1321_vm1, %v4912_v36  ;;  %v3460_v36 = vpop.f32.mrf.mxu0 }
 0x762   :  { %3623 = vmatprep.mubr.msk.bf16.mxu1 %vm1321_vm1, %v5013_v14  ;;  %v2668_v2 = vadd.f32 %v5119_v59, %v3460_v36 }
 0x763   :  { %v1205_v14 = vpop.f32.mrf.mxu0 }
 0x764   :  { %v2666_v31 = vadd.f32 %v5125_v61, %v1205_v14 }
 0x769   :  { %3624 = vmatmul.mubr.msk.bf16.gmra.mxu1 %vm1321_vm1, %v5020_v1  ;;  %v3463_v1 = vpop.f32.mrf.mxu0 }
 0x76a   :  { %3627 = vmatprep.mubr.msk.bf16.mxu1 %vm1321_vm1, %v5027_v17  ;;  %v2671_v27 = vadd.f32 %v5087_v22, %v3463_v1 }
 0x76b   :  { %v1218_v63 = vpop.f32.mrf.mxu0 }
 0x76c   :  { %v2669_v43 = vadd.f32 %v5095_v21, %v1218_v63 }
 0x76d   :  { %v3464_v17 = vpop.f32.mrf.mxu0 }
 0x76e   :  { %v2672_v16 = vadd.f32 %v5107_v41, %v3464_v17 }
 0x76f   :  { %v1221_v48 = vpop.f32.mrf.mxu0 }
 0x770   :  { %v2670_v22 = vadd.f32 %v5113_v40, %v1221_v48 }
 0x771   :  { %3628 = vmatmul.mubr.msk.bf16.gmra.mxu1 %vm1321_vm1, %v5034_v15  ;;  %v3467_v10 = vpop.f32.mrf.mxu0 }
 0x772   :  { %3635 = vmatprep.mubr.msk.bf16.mxu1 %vm4121_vm3, %v4120_v33  ;;  %v2675_v17 = vadd.f32 %v5155_v5, %v3467_v10 }
 0x773   :  { %v5214_v37 = vpop.f32.mrf.mxu0 }
 0x775   :  { %v5216_v13 = vpop.f32.mrf.mxu0 }
 0x777   :  { %v5219_v12 = vpop.f32.mrf.mxu0 }
 0x779   :  { %v3471_v42 = vpop.f32.mrf.mxu0 }
 0x77a   :  { %v2679_v41 = vadd.f32 %v5131_v52, %v3471_v42 }
 0x77b   :  { %v1250_v35 = vpop.f32.mrf.mxu0 }
 0x77c   :  { %v2677_v8 = vadd.f32 %v5137_v20, %v1250_v35 }
 0x77d   :  { %v3472_v40 = vpop.f32.mrf.mxu0 }
 0x77e   :  { %v2680_v30 = vadd.f32 %v5143_v54, %v3472_v40  ;;  %v2676_v54 = vadd.f32 %v5169_v18, %v5216_v13 }
 0x77f   :  { %v1253_v61 = vpop.f32.mrf.mxu0 }
 0x780   :  { %v2678_v19 = vadd.f32 %v5149_v7, %v1253_v61 }
 0x819   :  { %v3617_v15 = vpop.f32.mrf.mxu1 }
 0x81a   :  { %v2782_v47 = vadd.f32 %v3617_v15, %v2667_v32 }
 0x81b   :  { %v2717_v55 = vpop.f32.mrf.mxu1 }
 0x81c   :  { %v2780_v25 = vadd.f32 %v2717_v55, %v2665_v45 }
 0x81d   :  { %v3618_v0 = vpop.f32.mrf.mxu1 }
 0x81e   :  { %v2783_v26 = vadd.f32 %v3618_v0, %v2668_v2 }
 0x81f   :  { %v2720_v51 = vpop.f32.mrf.mxu1 }
 0x820   :  { %v2781_v24 = vadd.f32 %v2720_v51, %v2666_v31 }
 0x821   :  { %v3621_v46 = vpop.f32.mrf.mxu1 }
 0x822   :  { %v2786_v49 = vadd.f32 %v3621_v46, %v2671_v27 }
 0x823   :  { %v2733_v57 = vpop.f32.mrf.mxu1 }
 0x824   :  { %v2784_v11 = vadd.f32 %v2733_v57, %v2669_v43  ;;  %4005 = vtanh.f32 %v2786_v49  ;;  %v2674_v57 = vadd.f32 %v5176_v58, %v5219_v12 }
 0x825   :  { %v3622_v44 = vpop.f32.mrf.mxu1  ;;  %4007 = vtanh.f32 %v2782_v47 }
 0x826   :  { %v2787_v56 = vadd.f32 %v3622_v44, %v2672_v16  ;;  %4009 = vtanh.f32 %v2780_v25 }
 0x827   :  { %v2736_v3 = vpop.f32.mrf.mxu1  ;;  %4011 = vtanh.f32 %v2784_v11 }
 0x828   :  { %v2785_v50 = vadd.f32 %v2736_v3, %v2670_v22  ;;  %4013 = vtanh.f32 %v2787_v56  ;;  %v2673_v3 = vadd.f32 %v5162_v4, %v5214_v37 }
 0x829   :  { %v3625_v38 = vpop.f32.mrf.mxu1 }
 0x82a   :  { %4015 = vtanh.f32 %v2785_v50  ;;  %v2790_v7 = vadd.f32 %v3625_v38, %v2675_v17 }
 0x82b   :  { %v2749_v6 = vpop.f32.mrf.mxu1  ;;  %4017 = vtanh.f32 %v2783_v26 }
 0x82c   :  { %4019 = vtanh.f32 %v2781_v24  ;;  %v2788_v16 = vadd.f32 %v2749_v6, %v2673_v3  ;;  %v2915_v3 = vld [vmem:[%s5270_s7] sm:$0x1] }
 0x82d   :  { %v3626_v21 = vpop.f32.mrf.mxu1 }
 0x82e   :  { %v2791_v45 = vadd.f32 %v3626_v21, %v2676_v54 }
 0x82f   :  { %v2752_v9 = vpop.f32.mrf.mxu1 }
 0x830   :  { %v2789_v18 = vadd.f32 %v2752_v9, %v2674_v57 }
 0x831   :  { %v3629_v59 = vpop.f32.mrf.mxu1  ;;  %v4006_v14 = vpop.eup %4005 }
 0x832   :  { %v2794_v39 = vadd.f32 %v3629_v59, %v2679_v41  ;;  %v4008_v63 = vpop.eup %4007  ;;  %v2822_v15 = vmul.f32 0.5, %v4006_v14 }
 0x833   :  { %v2765_v62 = vpop.f32.mrf.mxu1  ;;  %v4010_v20 = vpop.eup %4009  ;;  %v2814_v0 = vmul.f32 0.5, %v4008_v63 }
 0x834   :  { %4021 = vtanh.f32 %v2794_v39  ;;  %v2792_v23 = vadd.f32 %v2765_v62, %v2677_v8  ;;  %v4012_v48 = vpop.eup %4011  ;;  %v2812_v27 = vmul.f32 0.5, %v4010_v20  ;;  %v2826_v44 = vadd.f32 0.5, %v2822_v15 }
 0x835   :  { %v3630_v53 = vpop.f32.mrf.mxu1  ;;  %v4014_v55 = vpop.eup %4013  ;;  %v2820_v5 = vmul.f32 0.5, %v4012_v48  ;;  %v2818_v49 = vadd.f32 0.5, %v2814_v0  ;;  %v3724_v0 = vld [vmem:[%s5267_s4] sm:$0x1f]  }
 0x836   :  { %4023 = vtanh.f32 %v2792_v23  ;;  %v2795_v52 = vadd.f32 %v3630_v53, %v2680_v30  ;;  %v2823_v10 = vmul.f32 0.5, %v4014_v55  ;;  %v2816_v13 = vadd.f32 0.5, %v2812_v27 }
 0x837   :  { %v2768_v36 = vpop.f32.mrf.mxu1  ;;  %v4016_v51 = vpop.eup %4015  ;;  %v2838_v58 = vmul.f32 %v2826_v44, %v5182_v29  ;;  %v2824_v12 = vadd.f32 0.5, %v2820_v5 }
 0x838   :  { %v2793_v1 = vadd.f32 %v2768_v36, %v2678_v19  ;;  %4025 = vtanh.f32 %v2795_v52  ;;  %v4018_v46 = vpop.eup %4017  ;;  %v2821_v42 = vmul.f32 0.5, %v4016_v51  ;;  %v2827_v11 = vadd.f32 0.5, %v2823_v10  ;;  %v2860_v51 = vld [vmem:[%s5268_s5] sm:$0xff] }
 0x839   :  { %v4020_v32 = vpop.eup %4019  ;;  %v2815_v43 = vmul.f32 0.5, %v4018_v46  ;;  %v2836_v26 = vmul.f32 %v2824_v12, %v5184_v28  ;;  %v2861_v46 = vld [vmem:[%s5268_s5 + $0x8] sm:$0x3]  ;;  %s4122_s5 = smov [#allocation2]  }
 0x83a   :  { %4027 = vtanh.f32 %v2793_v1  ;;  %v2813_v25 = vmul.f32 0.5, %v4020_v32  ;;  %v2825_v2 = vadd.f32 0.5, %v2821_v42  ;;  %v2839_v21 = vmul.f32 %v2827_v11, %v5189_v34  ;;  %s2977_s30 = sshll.u32 %s4122_s5, 4  ;;  %s2978_s30 = int_to_ptr.vmem [resolvable:$true] %s2977_s30 }
 0x83b   :  { %4029 = vtanh.f32 %v2790_v7  ;;  %v2819_v56 = vadd.f32 0.5, %v2815_v43  ;;  %s4101_s9 = scalar_lea.vmem %s2978_s30, 32  ;;  %p4102_p1 = scmp.lt.s32.totalorder %s2978_s30, %s2978_s30 }
 0x83c   :  { %4031 = vtanh.f32 %v2791_v45  ;;  %v2817_v31 = vadd.f32 0.5, %v2813_v25  ;;  %v2837_v24 = vmul.f32 %v2825_v2, %v5192_v60 }
 0x83d   :  { %4033 = vtanh.f32 %v2789_v18 }
 0x83e   :  { %4035 = vtanh.f32 %v2788_v16 }
 0x841   :  { %v4022_v47 = vpop.eup %4021 }
 0x842   :  { %v2842_v38 = vmul.f32 %v4022_v47, %v2818_v49  ;;  %v2913_v49 = vld [vmem:[%s5269_s6] sm:$0x1]  ;;  %s4097_s6 = scalar_lea.vmem %s2978_s30, 16 }
 0x843   :  { %v4024_v22 = vpop.eup %4023  ;;  %p4098_p0 = scmp.ne.s32.totalorder %s2978_s30, %s4097_s6  ;;  %p4103_p2 = scmp.lt.s32.totalorder %s4101_s9, %s4097_s6 }
 0x844   :  { %v2846_v35 = vadd.f32 %v2842_v38, %v2838_v58  ;;  %v2840_v4 = vmul.f32 %v4024_v22, %v2816_v13 }
 0x845   :  { %v4026_v37 = vpop.eup %4025  ;;  %p4104_p3 = por %p4103_p2, %p4102_p1 }
 0x846   :  { %v2843_v6 = vmul.f32 %v4026_v37, %v2819_v56  ;;  %4037 = vtanh.f32 %v2846_v35  ;;  %v2844_v41 = vadd.f32 %v2840_v4, %v2836_v26 }
 0x847   :  { %v4028_v50 = vpop.eup %4027  ;;  %p4105_p4 = pnand %p4104_p3, %p4098_p0 }
 0x848   :  { %v2841_v29 = vmul.f32 %v4028_v50, %v2817_v31  ;;  %v2847_v40 = vadd.f32 %v2843_v6, %v2839_v21  ;;  %v4030_v59 = vpop.eup %4029 }
 0x849   :  { %v4032_v8 = vpop.eup %4031  ;;  %v2830_v61 = vmul.f32 0.5, %v4030_v59 }
 0x84a   :  { %v2845_v9 = vadd.f32 %v2841_v29, %v2837_v24  ;;  %4039 = vtanh.f32 %v2847_v40  ;;  %v4034_v39 = vpop.eup %4033  ;;  %v2831_v62 = vmul.f32 0.5, %v4032_v8 }
 0x84b   :  { %v4036_v28 = vpop.eup %4035  ;;  %v2829_v23 = vmul.f32 0.5, %v4034_v39  ;;  %v2834_v30 = vadd.f32 0.5, %v2830_v61 }
 0x84c   :  { %4041 = vtanh.f32 %v2845_v9  ;;  %v2828_v53 = vmul.f32 0.5, %v4036_v28  ;;  %v2835_v19 = vadd.f32 0.5, %v2831_v62 }
 0x84d   :  { %4043 = vtanh.f32 %v2844_v41  ;;  %v2833_v36 = vadd.f32 0.5, %v2829_v23 }
 0x84e   :  { %v2832_v17 = vadd.f32 0.5, %v2828_v53 }
 0x853   :  { %v4038_v34 = vpop.eup %4037 }
 0x854   :  { %v2854_v14 = vmul.f32 %v4038_v34, %v2834_v30 }
 0x857   :  { %v4040_v60 = vpop.eup %4039 }
 0x858   :  { %v2855_v1 = vmul.f32 %v4040_v60, %v2835_v19 }
 0x859   :  { %v4042_v52 = vpop.eup %4041 }
 0x85a   :  { %v4044_v63 = vpop.eup %4043  ;;  %v2859_v20 = vpack.c.bf16 %v2855_v1, %v2854_v14  ;;  %v2853_v48 = vmul.f32 %v4042_v52, %v2833_v36 }
 0x85b   :  { %v2852_v15 = vmul.f32 %v4044_v63, %v2832_v17 }
 0x85c   :  { %3632 = vmatpush3.bf16.msra.mxu1 %v2859_v20 }
 0x85d   :  { %3633 = vmatprep.subr.bf16.mxu1 %v4120_v33  ;;  %v2858_v55 = vpack.c.bf16 %v2853_v48, %v2852_v15 }
 0x860   :  { %3634 = vmatpush3.bf16.msra.mxu1 %v2858_v55 }
 0x863   :  { %3636 = vmatmul.mubr.msk.bf16.vlgmr.msra.gmra.mxu1 %vm1321_vm1, %v3724_v0 }
 0x923   :  { %v2904_v54 = vpop.f32.mrf.mxu1 }
 0x924   :  { %v2905_v27 = vadd.f32 %v2904_v54, %v2860_v51 }
 0x925   :  { %v3637_v7 = vpop.f32.mrf.mxu1 }
 0x926   :  { %v2911_v44 = vmax.f32 %v2905_v27, 0.0 }
 0x927   :  { %v2907_v33 = vpop.f32.mrf.mxu1 }
 0x928   :  { %v2908_v57 = vadd.f32 %v2907_v33, %v2861_v46 }
 0x929   :  { %v3638_v32 = vpop.f32.mrf.mxu1 }
 0x92a   :  { %v2912_v5 = vmax.f32 %v2908_v57, 0.0 }
 0x92c   :  { %v2914_v10 = vpack.c.bf16 %v2912_v5, %v2911_v44 }
 0x92e   :  { %v2922_v45 = vsel %vm2920_vm4, %v2914_v10, 0 }
 0x92f   :  { %3640 = vmatpush3.bf16.msra.mxu0 %v2922_v45 }
 0x932   :  { %3642 = vmatmul.mubr.msk.bf16.vlgmr.msra.gmra.mxu0 %vm2916_vm5, %v2913_v49 }
 0x9f2   :  { %v2958_v42 = vpop.f32.mrf.mxu0 }
 0x9f3   :  { %v2959_v47 = vadd.f32 %v2958_v42, %v2915_v3 }
 0x9f4   :  { %v3643_v43 = vpop.f32.mrf.mxu0 }
 0x9f5   :  { %v3190_v18 = vmul.f32 -1.442695, %v2959_v47 }
 0x9f6   :  { %v2961_v13 = vpop.f32.mrf.mxu0 }
 0x9f7   :  { %4045 = vpow2.f32 %v3190_v18 }
 0x9f8   :  { %v3644_v25 = vpop.f32.mrf.mxu0 }
 0xa04   :  { %v4046_v16 = vpop.eup %4045 }
 0xa05   :  { %v2967_v38 = vadd.f32 1.0, %v4046_v16 }
 0xa07   :  { %4047 = vrcp.f32 %v2967_v38 }
 0xa14   :  { %v4048_v22 = vpop.eup %4047 }
 0xa15   :  { %2970 = vst [vmem:[#allocation2] sm:$0x1] %v4048_v22 }
 0xa16   :  { %4108 = shalt.err (!%p4105_p4)
}
 0xa17   :  { %2980 = dma.vmem_to_hbm [thread:$0]  %s2978_s30, 16, %s5271_s8, [#allocation3]  }
 0xa18   :  { %4117 = dma.done.wait [#allocation3], 16  }
 0xa19   :  { %4118 = vsyncadd [#allocation3], 4294967280 }
 0xa1a   :  { %2984 = vsyncpa [#allocation3], 1 }

</bundles_post_ra>
